<compile_context>
chip_gen: v5e
topology: v5e:2x2
jax: 0.10.0
libtpu: 0.0.40
codegen_flags: <defaults>
</compile_context>

<pallas_src>
import functools

import jax
import jax.numpy as jnp
import numpy as np
from jax import lax
from jax.experimental import pallas as pl
from jax.experimental.pallas import tpu as pltpu


def _round_up(x: int, m: int) -> int:
    return (x + m - 1) // m * m


# --------------------------------------------------------------------------------------
# Fused kernel: per-chunk input projection (MXU) + recurrent GRU cell + discounted
# hidden-state accumulation + preference probability (last chunk only).
# --------------------------------------------------------------------------------------
def _recurrent_pref_kernel(noise_prob, threshold, TT, Hp, Bp, last_steps,
                           disc_ref, x_ref, h0_ref, wih_ref, bproj_ref,
                           whh_ref, bhn_ref, wout_ref,
                           out_ref, h_sc, acc_sc, gx_sc):
    c = pl.program_id(0)
    last = pl.num_programs(0) - 1
    rows = h_sc.shape[0]                                # 2 * Bp

    @pl.when(c == 0)
    def _init():
        h_sc[...] = h0_ref[...]
        acc_sc[...] = jnp.zeros_like(acc_sc)

    # ---- fused input projection for this chunk: one (TT*rows, D) @ (D, 3Hp) matmul ----
    # rows % 8 == 0 (and % 16 == 0 for bf16) -> relayout-free reshapes. gx kept in f32.
    tt, _, d = x_ref.shape
    x2 = x_ref[...].reshape(tt * rows, d)
    gx = jnp.dot(x2, wih_ref[...], preferred_element_type=jnp.float32) + bproj_ref[...]
    gx_sc[...] = gx.reshape(tt, rows, 3 * Hp)
    # NOTE: padded batch rows (x == 0) still pick up the folded bias, so they carry
    # bounded garbage hidden states through the recurrence; they are sliced away in the
    # wrapper and never reach the real outputs. Do not reuse padded rows of out/acc.

    t0 = c * TT
    bhn = jnp.broadcast_to(bhn_ref[...], (rows, Hp))    # hoisted broadcast (not CSE'd in loop)

    def step(i, carry):
        h, acc = carry
        gxi = gx_sc[i]                                  # (rows, 3Hp) f32, biases pre-folded
        gh = jnp.dot(h.astype(jnp.bfloat16), whh_ref[...],
                     preferred_element_type=jnp.float32)    # fused r|z|n hidden projection
        r = jax.nn.sigmoid(gxi[:, 0:Hp] + gh[:, 0:Hp])
        z = jax.nn.sigmoid(gxi[:, Hp:2 * Hp] + gh[:, Hp:2 * Hp])
        n = jnp.tanh(gxi[:, 2 * Hp:3 * Hp] + r * (gh[:, 2 * Hp:3 * Hp] + bhn))
        h_new = (1.0 - z) * n + z * h
        d_t = disc_ref[t0 + i]                          # discount^t (scalar from SMEM)
        return h_new, acc + d_t * h_new

    def run_chunk(nsteps):
        # unroll=True is fine while the (rows, Hp) f32 carries fit the 64-vreg file
        # (rows=16, Hp=128 -> 2 vregs each); drop unroll / row-tile before growing B.
        h, acc = lax.fori_loop(0, nsteps, step, (h_sc[...], acc_sc[...]), unroll=True)
        h_sc[...] = h
        acc_sc[...] = acc

    if last_steps == TT:                                # static: no padded timesteps
        run_chunk(TT)
    else:                                               # skip padded tail timesteps
        @pl.when(c != last)
        def _full():
            run_chunk(TT)

        @pl.when(c == last)
        def _tail():
            run_chunk(last_steps)

    @pl.when(c == last)
    def _final():
        # Linear reward head applied once to the discounted hidden-state sums. The
        # constant reward bias cancels in returns_diff for equal-length fragments.
        acc = acc_sc[...]
        diff_acc = acc[Bp:2 * Bp, :] - acc[0:Bp, :]                     # frag2 - frag1
        returns_diff = jnp.dot(diff_acc, wout_ref[...],
                               preferred_element_type=jnp.float32)      # (Bp, 1)
        returns_diff = jnp.clip(returns_diff, -threshold, threshold)
        model_prob = 1.0 / (1.0 + jnp.exp(returns_diff))
        out_ref[...] = noise_prob * 0.5 + (1.0 - noise_prob) * model_prob


def recurrent_preference_probs(x, h0, fused_params, *, noise_prob=0.0, discount=1.0,
                               threshold=50.0, max_chunk=32):
    """x: (T, 2B, D) time-major, rows = [frag1 of pairs 0..B-1 | frag2 of pairs 0..B-1].
    h0: (2B, H). fused_params = (wih (D,3H), whh (H,3H), bih (1,3H), bhh (1,3H),
    wout (H,1), bout (1,1)), gate order r|z|n. Returns p(frag1 > frag2), shape (B,)."""
    wih, whh, bih, bhh, wout, bout = fused_params
    del bout  # constant reward bias cancels in returns_diff (equal-length fragments)
    T, twoB, D = x.shape
    B = twoB // 2
    H = h0.shape[-1]

    Bp = max(8, _round_up(B, 8))        # sublane-pad each fragment half
    Hp = _round_up(H, 128)              # lane-pad hidden: fused gate slices 128-aligned
    rows = 2 * Bp
    TT = min(T, max_chunk)              # timesteps per grid step (unrolled in-kernel)
    n_chunks = pl.cdiv(T, TT)
    T_pad = n_chunks * TT
    last_steps = T - (n_chunks - 1) * TT    # real timesteps in the final chunk (static)

    f32 = jnp.float32
    bf16 = jnp.bfloat16

    # --- pad / reorder inputs. x is built directly in bf16 and D is NOT lane-padded
    #     (the full-D block is exempt from the 128 rule) -> minimal HBM traffic. Padded
    #     rows / timesteps never reach the real outputs. ---
    x_bf = x.astype(bf16)
    x_p = jnp.zeros((T_pad, rows, D), bf16)
    x_p = x_p.at[:T, :B, :].set(x_bf[:, :B])
    x_p = x_p.at[:T, Bp:Bp + B, :].set(x_bf[:, B:])

    h0_p = jnp.zeros((rows, Hp), f32)
    h0_p = h0_p.at[:B, :H].set(h0[:B])
    h0_p = h0_p.at[Bp:Bp + B, :H].set(h0[B:])

    def pad_gates(w, nrows_p):          # (nrows, 3H) -> (nrows_p, 3Hp), r|z|n 128-wide blocks
        out = jnp.zeros((nrows_p, 3 * Hp), f32)
        for g in range(3):
            out = out.at[:w.shape[0], g * Hp:g * Hp + H].set(w[:, g * H:(g + 1) * H])
        return out

    wih_p = pad_gates(wih, D)           # feature rows kept at the real D (no 128 padding)
    whh_p = pad_gates(whh, Hp)
    # Fold input biases (all gates) + hidden biases of the r/z gates into the per-chunk
    # projection; only the n-gate hidden bias stays per-step (it is multiplied by r).
    b_proj = pad_gates(bih.at[:, :2 * H].add(bhh[:, :2 * H]), 1)
    bhn_p = jnp.zeros((1, Hp), f32).at[:, :H].set(bhh[:, 2 * H:])
    wout_p = jnp.zeros((Hp, 1), f32).at[:H, :].set(wout)

    # Per-timestep discounts (padded tail entries are never read: tail loop is shorter).
    t_idx = jnp.arange(T_pad, dtype=f32)
    disc = jnp.where(t_idx < T, jnp.asarray(discount, f32) ** t_idx, f32(0.0))

    kernel = functools.partial(_recurrent_pref_kernel, float(noise_prob),
                               float(threshold), TT, Hp, Bp, int(last_steps))
    probs = pl.pallas_call(
        kernel,
        out_shape=jax.ShapeDtypeStruct((Bp, 1), jnp.float32),
        grid_spec=pltpu.PrefetchScalarGridSpec(
            num_scalar_prefetch=0,
            grid=(n_chunks,),
            in_specs=[
                pl.BlockSpec(memory_space=pltpu.MemorySpace.SMEM),      # discounts (T_pad,)
                pl.BlockSpec((TT, rows, D), lambda c: (c, 0, 0)),       # raw x chunk (bf16)
                pl.BlockSpec((rows, Hp), lambda c: (0, 0)),             # initial hidden state
                pl.BlockSpec((D, 3 * Hp), lambda c: (0, 0)),            # fused W_ih (bf16)
                pl.BlockSpec((1, 3 * Hp), lambda c: (0, 0)),            # folded proj bias
                pl.BlockSpec((Hp, 3 * Hp), lambda c: (0, 0)),           # fused W_hh (bf16)
                pl.BlockSpec((1, Hp), lambda c: (0, 0)),                # n-gate hidden bias
                pl.BlockSpec((Hp, 1), lambda c: (0, 0)),                # reward head weights
            ],
            out_specs=pl.BlockSpec((Bp, 1), lambda c: (0, 0)),
            scratch_shapes=[
                pltpu.VMEM((rows, Hp), jnp.float32),            # recurrent hidden state
                pltpu.VMEM((rows, Hp), jnp.float32),            # discounted-h accumulator
                pltpu.VMEM((TT, rows, 3 * Hp), jnp.float32),    # per-chunk gx (f32)
            ],
        ),
        compiler_params=pltpu.CompilerParams(dimension_semantics=("arbitrary",)),
    )(disc, x_p, h0_p, wih_p.astype(bf16), b_proj, whh_p.astype(bf16), bhn_p, wout_p)
    return probs[:B, 0]


def reference_probs(x, h0, fused_params, noise_prob, discount, threshold):
    """Pure-JAX (f32) reference mirroring RecurrentPreferenceModel semantics."""
    wih, whh, bih, bhh, wout, bout = fused_params
    T, twoB, _ = x.shape
    B = twoB // 2
    H = h0.shape[-1]

    def gru_step(h, x_t):
        gx = x_t @ wih + bih
        gh = h @ whh + bhh
        r = jax.nn.sigmoid(gx[:, :H] + gh[:, :H])
        z = jax.nn.sigmoid(gx[:, H:2 * H] + gh[:, H:2 * H])
        n = jnp.tanh(gx[:, 2 * H:] + r * gh[:, 2 * H:])
        h_new = (1.0 - z) * n + z * h
        rew = h_new @ wout + bout
        return h_new, rew[:, 0]

    _, rews = jax.lax.scan(gru_step, h0, x)                  # (T, 2B)
    discounts = discount ** jnp.arange(T, dtype=jnp.float32)
    returns = (discounts[:, None] * rews).sum(axis=0)        # (2B,)
    diff = jnp.clip(returns[B:] - returns[:B], -threshold, threshold)
    p = 1.0 / (1.0 + jnp.exp(diff))
    return noise_prob * 0.5 + (1.0 - noise_prob) * p


if __name__ == "__main__":
    B, T, OBS, ACT, H = 2, 8, 16, 8, 32                      # B pairs, T-step fragments
    D = OBS + ACT + OBS + 1

    key = jax.random.PRNGKey(0)
    ks = jax.random.split(key, 11)

    # Transition data for B fragment pairs (axis 1 = the two fragments of a pair).
    states = jax.random.normal(ks[0], (B, 2, T, OBS), jnp.float32)
    acts = jax.random.normal(ks[1], (B, 2, T, ACT), jnp.float32)
    next_states = jax.random.normal(ks[2], (B, 2, T, OBS), jnp.float32)
    dones = (jax.random.uniform(ks[3], (B, 2, T)) < 0.1).astype(jnp.float32)
    hidden0 = jax.random.normal(ks[4], (B, 2, H), jnp.float32) * 0.1

    # Deterministic synthetic recurrent reward-net parameters (GRU cell + linear head).
    wih = jax.random.normal(ks[5], (D, 3 * H), jnp.float32) * 0.1
    whh = jax.random.normal(ks[6], (H, 3 * H), jnp.float32) * 0.1
    bih = jax.random.normal(ks[7], (1, 3 * H), jnp.float32) * 0.01
    bhh = jax.random.normal(ks[8], (1, 3 * H), jnp.float32) * 0.01
    wout = jax.random.normal(ks[9], (H, 1), jnp.float32) * 0.1
    bout = jnp.zeros((1, 1), jnp.float32)
    fused_params = (wih, whh, bih, bhh, wout, bout)

    # Glue (plain JAX): model.preprocess == concat(state, action, next_state, done).
    feat = jnp.concatenate([states, acts, next_states, dones[..., None]], axis=-1)  # (B,2,T,D)
    x = jnp.transpose(feat, (2, 1, 0, 3)).reshape(T, 2 * B, D)   # (T, 2B, D) time-major
    h0 = jnp.transpose(hidden0, (1, 0, 2)).reshape(2 * B, H)     # (2B, H)

    noise_prob, discount, threshold = 0.1, 0.97, 50.0
    ref = reference_probs(x, h0, fused_params, noise_prob, discount, threshold)

    # Single-chunk path (whole sequence in one grid step).
    probs = recurrent_preference_probs(x, h0, fused_params, noise_prob=noise_prob,
                                       discount=discount, threshold=threshold)
    probs = jax.block_until_ready(probs)
    np.testing.assert_allclose(np.asarray(probs), np.asarray(ref), rtol=2e-2, atol=2e-2)

    # Multi-chunk path with a ragged tail (T=8, TT=3 -> chunks of 3/3/2) to exercise the
    # scratch carry across grid steps and the statically-shortened last-chunk loop.
    probs_mc = recurrent_preference_probs(x, h0, fused_params, noise_prob=noise_prob,
                                          discount=discount, threshold=threshold,
                                          max_chunk=3)
    probs_mc = jax.block_until_ready(probs_mc)
    np.testing.assert_allclose(np.asarray(probs_mc), np.asarray(ref), rtol=2e-2, atol=2e-2)

    print("KERNEL_OK")
</pallas_src>

<mosaic_0001>
module attributes {stable_mosaic.version = 11 : i64} {
  func.func @_recurrent_pref_kernel(%arg0: i32, %arg1: memref<8xf32, #tpu.memory_space<smem>>, %arg2: memref<8x16x41xbf16, #tpu.memory_space<vmem>>, %arg3: memref<16x128xf32, #tpu.memory_space<vmem>>, %arg4: memref<41x384xbf16, #tpu.memory_space<vmem>>, %arg5: memref<1x384xf32, #tpu.memory_space<vmem>>, %arg6: memref<128x384xbf16, #tpu.memory_space<vmem>>, %arg7: memref<1x128xf32, #tpu.memory_space<vmem>>, %arg8: memref<128x1xf32, #tpu.memory_space<vmem>>, %arg9: memref<8x1xf32, #tpu.memory_space<vmem>>, %arg10: memref<16x128xf32, #tpu.memory_space<vmem>>, %arg11: memref<16x128xf32, #tpu.memory_space<vmem>>, %arg12: memref<8x16x384xf32, #tpu.memory_space<vmem>>) attributes {dimension_semantics = [#tpu.dimension_semantics<arbitrary>], iteration_bounds = array<i64: 1>, scalar_prefetch = 0 : i64, scratch_operands = 3 : i64, tpu.core_type = #tpu.core_type<tc>, window_params = [{transform_indices = @transform_0, window_bounds = array<i64: 8>}, {transform_indices = @transform_1, window_bounds = array<i64: 8, 16, 41>}, {pipeline_mode = #tpu.pipeline_mode<synchronous>, transform_indices = @transform_2, window_bounds = array<i64: 16, 128>}, {pipeline_mode = #tpu.pipeline_mode<synchronous>, transform_indices = @transform_3, window_bounds = array<i64: 41, 384>}, {pipeline_mode = #tpu.pipeline_mode<synchronous>, transform_indices = @transform_4, window_bounds = array<i64: 1, 384>}, {pipeline_mode = #tpu.pipeline_mode<synchronous>, transform_indices = @transform_5, window_bounds = array<i64: 128, 384>}, {pipeline_mode = #tpu.pipeline_mode<synchronous>, transform_indices = @transform_6, window_bounds = array<i64: 1, 128>}, {pipeline_mode = #tpu.pipeline_mode<synchronous>, transform_indices = @transform_7, window_bounds = array<i64: 128, 1>}, {pipeline_mode = #tpu.pipeline_mode<synchronous>, transform_indices = @transform_8, window_bounds = array<i64: 8, 1>}]} {
    %c0_i32 = arith.constant 0 : i32
    %0 = arith.cmpi eq, %arg0, %c0_i32 : i32
    %1 = arith.extui %0 : i1 to i32
    %c0_i32_0 = arith.constant 0 : i32
    %2 = arith.cmpi ne, %1, %c0_i32_0 : i32
    scf.if %2 {
      %c0_88 = arith.constant 0 : index
      %c0_89 = arith.constant 0 : index
      %335 = vector.load %arg3[%c0_88, %c0_89] : memref<16x128xf32, #tpu.memory_space<vmem>>, vector<16x128xf32>
      %c0_90 = arith.constant 0 : index
      %c0_91 = arith.constant 0 : index
      %336 = vector.load %arg10[%c0_90, %c0_91] : memref<16x128xf32, #tpu.memory_space<vmem>>, vector<16x128xf32>
      tpu.vector_store %arg10[%c0_90, %c0_91], %335 {strides = array<i32>} : memref<16x128xf32, #tpu.memory_space<vmem>>, vector<16x128xf32>,
      %cst_92 = arith.constant 0.000000e+00 : f32
      %337 = vector.broadcast %cst_92 : f32 to vector<16x128xf32>
      %c0_93 = arith.constant 0 : index
      %c0_94 = arith.constant 0 : index
      %338 = vector.load %arg11[%c0_93, %c0_94] : memref<16x128xf32, #tpu.memory_space<vmem>>, vector<16x128xf32>
      tpu.vector_store %arg11[%c0_93, %c0_94], %337 {strides = array<i32>} : memref<16x128xf32, #tpu.memory_space<vmem>>, vector<16x128xf32>,
    } else {
    }
    %c0 = arith.constant 0 : index
    %c0_1 = arith.constant 0 : index
    %c0_2 = arith.constant 0 : index
    %3 = vector.load %arg2[%c0, %c0_1, %c0_2] : memref<8x16x41xbf16, #tpu.memory_space<vmem>>, vector<8x16x41xbf16>
    %4 = vector.shape_cast %3 : vector<8x16x41xbf16> to vector<128x41xbf16>
    %c0_3 = arith.constant 0 : index
    %c0_4 = arith.constant 0 : index
    %5 = vector.load %arg4[%c0_3, %c0_4] : memref<41x384xbf16, #tpu.memory_space<vmem>>, vector<41x384xbf16>
    %cst = arith.constant dense<0.000000e+00> : vector<128x384xf32>
    %6 = tpu.matmul %4, %5, %cst {dimension_numbers = #tpu.dot_dimension_numbers<[1], [0], [0], [1], [0, 0, 1, 1], [], []>} : vector<128x41xbf16>, vector<41x384xbf16>, vector<128x384xf32> -> vector<128x384xf32>
    %c0_5 = arith.constant 0 : index
    %c0_6 = arith.constant 0 : index
    %7 = vector.load %arg5[%c0_5, %c0_6] : memref<1x384xf32, #tpu.memory_space<vmem>>, vector<1x384xf32>
    %8 = vector.broadcast %7 : vector<1x384xf32> to vector<128x384xf32>
    %9 = arith.addf %6, %8 : vector<128x384xf32>
    %10 = vector.shape_cast %9 : vector<128x384xf32> to vector<8x16x384xf32>
    %c0_7 = arith.constant 0 : index
    %c0_8 = arith.constant 0 : index
    %c0_9 = arith.constant 0 : index
    %11 = vector.load %arg12[%c0_7, %c0_8, %c0_9] : memref<8x16x384xf32, #tpu.memory_space<vmem>>, vector<8x16x384xf32>
    tpu.vector_store %arg12[%c0_7, %c0_8, %c0_9], %10 {strides = array<i32>} : memref<8x16x384xf32, #tpu.memory_space<vmem>>, vector<8x16x384xf32>,
    %c8_i32 = arith.constant 8 : i32
    %12 = arith.muli %arg0, %c8_i32 : i32
    %c0_10 = arith.constant 0 : index
    %c0_11 = arith.constant 0 : index
    %13 = vector.load %arg7[%c0_10, %c0_11] : memref<1x128xf32, #tpu.memory_space<vmem>>, vector<1x128xf32>
    %14 = vector.shape_cast %13 : vector<1x128xf32> to vector<1x128xf32>
    %15 = vector.broadcast %14 : vector<1x128xf32> to vector<16x128xf32>
    %c0_12 = arith.constant 0 : index
    %c0_13 = arith.constant 0 : index
    %16 = vector.load %arg10[%c0_12, %c0_13] : memref<16x128xf32, #tpu.memory_space<vmem>>, vector<16x128xf32>
    %c0_14 = arith.constant 0 : index
    %c0_15 = arith.constant 0 : index
    %17 = vector.load %arg11[%c0_14, %c0_15] : memref<16x128xf32, #tpu.memory_space<vmem>>, vector<16x128xf32>
    %c0_i32_16 = arith.constant 0 : i32
    %18 = arith.index_cast %c0_i32_16 : i32 to index
    %c0_17 = arith.constant 0 : index
    %c0_18 = arith.constant 0 : index
    %19 = vector.load %arg12[%18, %c0_17, %c0_18] : memref<8x16x384xf32, #tpu.memory_space<vmem>>, vector<1x16x384xf32>
    %20 = vector.shape_cast %19 : vector<1x16x384xf32> to vector<16x384xf32>
    %21 = arith.truncf %16 : vector<16x128xf32> to vector<16x128xbf16>
    %c0_19 = arith.constant 0 : index
    %c0_20 = arith.constant 0 : index
    %22 = vector.load %arg6[%c0_19, %c0_20] : memref<128x384xbf16, #tpu.memory_space<vmem>>, vector<128x384xbf16>
    %cst_21 = arith.constant dense<0.000000e+00> : vector<16x384xf32>
    %23 = tpu.matmul %21, %22, %cst_21 {dimension_numbers = #tpu.dot_dimension_numbers<[1], [0], [0], [1], [0, 0, 1, 1], [], []>} : vector<16x128xbf16>, vector<128x384xbf16>, vector<16x384xf32> -> vector<16x384xf32>
    %24 = vector.extract_strided_slice %20 {offsets = [0, 0], sizes = [16, 128], strides = [1, 1]} : vector<16x384xf32> to vector<16x128xf32>
    %25 = vector.extract_strided_slice %23 {offsets = [0, 0], sizes = [16, 128], strides = [1, 1]} : vector<16x384xf32> to vector<16x128xf32>
    %26 = arith.addf %24, %25 : vector<16x128xf32>
    %27 = arith.negf %26 : vector<16x128xf32>
    %28 = math.exp %27 : vector<16x128xf32>
    %cst_22 = arith.constant 1.000000e+00 : f32
    %29 = vector.broadcast %cst_22 : f32 to vector<16x128xf32>
    %30 = arith.addf %29, %28 : vector<16x128xf32>
    %31 = arith.divf %29, %30 : vector<16x128xf32>
    %32 = vector.extract_strided_slice %20 {offsets = [0, 128], sizes = [16, 128], strides = [1, 1]} : vector<16x384xf32> to vector<16x128xf32>
    %33 = vector.extract_strided_slice %23 {offsets = [0, 128], sizes = [16, 128], strides = [1, 1]} : vector<16x384xf32> to vector<16x128xf32>
    %34 = arith.addf %32, %33 : vector<16x128xf32>
    %35 = arith.negf %34 : vector<16x128xf32>
    %36 = math.exp %35 : vector<16x128xf32>
    %cst_23 = arith.constant 1.000000e+00 : f32
    %37 = vector.broadcast %cst_23 : f32 to vector<16x128xf32>
    %38 = arith.addf %37, %36 : vector<16x128xf32>
    %39 = arith.divf %37, %38 : vector<16x128xf32>
    %40 = vector.extract_strided_slice %20 {offsets = [0, 256], sizes = [16, 128], strides = [1, 1]} : vector<16x384xf32> to vector<16x128xf32>
    %41 = vector.extract_strided_slice %23 {offsets = [0, 256], sizes = [16, 128], strides = [1, 1]} : vector<16x384xf32> to vector<16x128xf32>
    %42 = arith.addf %41, %15 : vector<16x128xf32>
    %43 = arith.mulf %31, %42 : vector<16x128xf32>
    %44 = arith.addf %40, %43 : vector<16x128xf32>
    %45 = math.tanh %44 : vector<16x128xf32>
    %cst_24 = arith.constant 1.000000e+00 : f32
    %46 = vector.broadcast %cst_24 : f32 to vector<16x128xf32>
    %47 = arith.subf %46, %39 : vector<16x128xf32>
    %48 = arith.mulf %47, %45 : vector<16x128xf32>
    %49 = arith.mulf %39, %16 : vector<16x128xf32>
    %50 = arith.addf %48, %49 : vector<16x128xf32>
    %51 = arith.addi %12, %c0_i32_16 : i32
    %52 = arith.index_cast %51 : i32 to index
    %53 = memref.load %arg1[%52] : memref<8xf32, #tpu.memory_space<smem>>
    %54 = vector.broadcast %53 : f32 to vector<16x128xf32>
    %55 = arith.mulf %54, %50 : vector<16x128xf32>
    %56 = arith.addf %17, %55 : vector<16x128xf32>
    %c1_i32 = arith.constant 1 : i32
    %57 = arith.index_cast %c1_i32 : i32 to index
    %c0_25 = arith.constant 0 : index
    %c0_26 = arith.constant 0 : index
    %58 = vector.load %arg12[%57, %c0_25, %c0_26] : memref<8x16x384xf32, #tpu.memory_space<vmem>>, vector<1x16x384xf32>
    %59 = vector.shape_cast %58 : vector<1x16x384xf32> to vector<16x384xf32>
    %60 = arith.truncf %50 : vector<16x128xf32> to vector<16x128xbf16>
    %c0_27 = arith.constant 0 : index
    %c0_28 = arith.constant 0 : index
    %61 = vector.load %arg6[%c0_27, %c0_28] : memref<128x384xbf16, #tpu.memory_space<vmem>>, vector<128x384xbf16>
    %cst_29 = arith.constant dense<0.000000e+00> : vector<16x384xf32>
    %62 = tpu.matmul %60, %61, %cst_29 {dimension_numbers = #tpu.dot_dimension_numbers<[1], [0], [0], [1], [0, 0, 1, 1], [], []>} : vector<16x128xbf16>, vector<128x384xbf16>, vector<16x384xf32> -> vector<16x384xf32>
    %63 = vector.extract_strided_slice %59 {offsets = [0, 0], sizes = [16, 128], strides = [1, 1]} : vector<16x384xf32> to vector<16x128xf32>
    %64 = vector.extract_strided_slice %62 {offsets = [0, 0], sizes = [16, 128], strides = [1, 1]} : vector<16x384xf32> to vector<16x128xf32>
    %65 = arith.addf %63, %64 : vector<16x128xf32>
    %66 = arith.negf %65 : vector<16x128xf32>
    %67 = math.exp %66 : vector<16x128xf32>
    %cst_30 = arith.constant 1.000000e+00 : f32
    %68 = vector.broadcast %cst_30 : f32 to vector<16x128xf32>
    %69 = arith.addf %68, %67 : vector<16x128xf32>
    %70 = arith.divf %68, %69 : vector<16x128xf32>
    %71 = vector.extract_strided_slice %59 {offsets = [0, 128], sizes = [16, 128], strides = [1, 1]} : vector<16x384xf32> to vector<16x128xf32>
    %72 = vector.extract_strided_slice %62 {offsets = [0, 128], sizes = [16, 128], strides = [1, 1]} : vector<16x384xf32> to vector<16x128xf32>
    %73 = arith.addf %71, %72 : vector<16x128xf32>
    %74 = arith.negf %73 : vector<16x128xf32>
    %75 = math.exp %74 : vector<16x128xf32>
    %cst_31 = arith.constant 1.000000e+00 : f32
    %76 = vector.broadcast %cst_31 : f32 to vector<16x128xf32>
    %77 = arith.addf %76, %75 : vector<16x128xf32>
    %78 = arith.divf %76, %77 : vector<16x128xf32>
    %79 = vector.extract_strided_slice %59 {offsets = [0, 256], sizes = [16, 128], strides = [1, 1]} : vector<16x384xf32> to vector<16x128xf32>
    %80 = vector.extract_strided_slice %62 {offsets = [0, 256], sizes = [16, 128], strides = [1, 1]} : vector<16x384xf32> to vector<16x128xf32>
    %81 = arith.addf %80, %15 : vector<16x128xf32>
    %82 = arith.mulf %70, %81 : vector<16x128xf32>
    %83 = arith.addf %79, %82 : vector<16x128xf32>
    %84 = math.tanh %83 : vector<16x128xf32>
    %cst_32 = arith.constant 1.000000e+00 : f32
    %85 = vector.broadcast %cst_32 : f32 to vector<16x128xf32>
    %86 = arith.subf %85, %78 : vector<16x128xf32>
    %87 = arith.mulf %86, %84 : vector<16x128xf32>
    %88 = arith.mulf %78, %50 : vector<16x128xf32>
    %89 = arith.addf %87, %88 : vector<16x128xf32>
    %90 = arith.addi %12, %c1_i32 : i32
    %91 = arith.index_cast %90 : i32 to index
    %92 = memref.load %arg1[%91] : memref<8xf32, #tpu.memory_space<smem>>
    %93 = vector.broadcast %92 : f32 to vector<16x128xf32>
    %94 = arith.mulf %93, %89 : vector<16x128xf32>
    %95 = arith.addf %56, %94 : vector<16x128xf32>
    %c2_i32 = arith.constant 2 : i32
    %96 = arith.index_cast %c2_i32 : i32 to index
    %c0_33 = arith.constant 0 : index
    %c0_34 = arith.constant 0 : index
    %97 = vector.load %arg12[%96, %c0_33, %c0_34] : memref<8x16x384xf32, #tpu.memory_space<vmem>>, vector<1x16x384xf32>
    %98 = vector.shape_cast %97 : vector<1x16x384xf32> to vector<16x384xf32>
    %99 = arith.truncf %89 : vector<16x128xf32> to vector<16x128xbf16>
    %c0_35 = arith.constant 0 : index
    %c0_36 = arith.constant 0 : index
    %100 = vector.load %arg6[%c0_35, %c0_36] : memref<128x384xbf16, #tpu.memory_space<vmem>>, vector<128x384xbf16>
    %cst_37 = arith.constant dense<0.000000e+00> : vector<16x384xf32>
    %101 = tpu.matmul %99, %100, %cst_37 {dimension_numbers = #tpu.dot_dimension_numbers<[1], [0], [0], [1], [0, 0, 1, 1], [], []>} : vector<16x128xbf16>, vector<128x384xbf16>, vector<16x384xf32> -> vector<16x384xf32>
    %102 = vector.extract_strided_slice %98 {offsets = [0, 0], sizes = [16, 128], strides = [1, 1]} : vector<16x384xf32> to vector<16x128xf32>
    %103 = vector.extract_strided_slice %101 {offsets = [0, 0], sizes = [16, 128], strides = [1, 1]} : vector<16x384xf32> to vector<16x128xf32>
    %104 = arith.addf %102, %103 : vector<16x128xf32>
    %105 = arith.negf %104 : vector<16x128xf32>
    %106 = math.exp %105 : vector<16x128xf32>
    %cst_38 = arith.constant 1.000000e+00 : f32
    %107 = vector.broadcast %cst_38 : f32 to vector<16x128xf32>
    %108 = arith.addf %107, %106 : vector<16x128xf32>
    %109 = arith.divf %107, %108 : vector<16x128xf32>
    %110 = vector.extract_strided_slice %98 {offsets = [0, 128], sizes = [16, 128], strides = [1, 1]} : vector<16x384xf32> to vector<16x128xf32>
    %111 = vector.extract_strided_slice %101 {offsets = [0, 128], sizes = [16, 128], strides = [1, 1]} : vector<16x384xf32> to vector<16x128xf32>
    %112 = arith.addf %110, %111 : vector<16x128xf32>
    %113 = arith.negf %112 : vector<16x128xf32>
    %114 = math.exp %113 : vector<16x128xf32>
    %cst_39 = arith.constant 1.000000e+00 : f32
    %115 = vector.broadcast %cst_39 : f32 to vector<16x128xf32>
    %116 = arith.addf %115, %114 : vector<16x128xf32>
    %117 = arith.divf %115, %116 : vector<16x128xf32>
    %118 = vector.extract_strided_slice %98 {offsets = [0, 256], sizes = [16, 128], strides = [1, 1]} : vector<16x384xf32> to vector<16x128xf32>
    %119 = vector.extract_strided_slice %101 {offsets = [0, 256], sizes = [16, 128], strides = [1, 1]} : vector<16x384xf32> to vector<16x128xf32>
    %120 = arith.addf %119, %15 : vector<16x128xf32>
    %121 = arith.mulf %109, %120 : vector<16x128xf32>
    %122 = arith.addf %118, %121 : vector<16x128xf32>
    %123 = math.tanh %122 : vector<16x128xf32>
    %cst_40 = arith.constant 1.000000e+00 : f32
    %124 = vector.broadcast %cst_40 : f32 to vector<16x128xf32>
    %125 = arith.subf %124, %117 : vector<16x128xf32>
    %126 = arith.mulf %125, %123 : vector<16x128xf32>
    %127 = arith.mulf %117, %89 : vector<16x128xf32>
    %128 = arith.addf %126, %127 : vector<16x128xf32>
    %129 = arith.addi %12, %c2_i32 : i32
    %130 = arith.index_cast %129 : i32 to index
    %131 = memref.load %arg1[%130] : memref<8xf32, #tpu.memory_space<smem>>
    %132 = vector.broadcast %131 : f32 to vector<16x128xf32>
    %133 = arith.mulf %132, %128 : vector<16x128xf32>
    %134 = arith.addf %95, %133 : vector<16x128xf32>
    %c3_i32 = arith.constant 3 : i32
    %135 = arith.index_cast %c3_i32 : i32 to index
    %c0_41 = arith.constant 0 : index
    %c0_42 = arith.constant 0 : index
    %136 = vector.load %arg12[%135, %c0_41, %c0_42] : memref<8x16x384xf32, #tpu.memory_space<vmem>>, vector<1x16x384xf32>
    %137 = vector.shape_cast %136 : vector<1x16x384xf32> to vector<16x384xf32>
    %138 = arith.truncf %128 : vector<16x128xf32> to vector<16x128xbf16>
    %c0_43 = arith.constant 0 : index
    %c0_44 = arith.constant 0 : index
    %139 = vector.load %arg6[%c0_43, %c0_44] : memref<128x384xbf16, #tpu.memory_space<vmem>>, vector<128x384xbf16>
    %cst_45 = arith.constant dense<0.000000e+00> : vector<16x384xf32>
    %140 = tpu.matmul %138, %139, %cst_45 {dimension_numbers = #tpu.dot_dimension_numbers<[1], [0], [0], [1], [0, 0, 1, 1], [], []>} : vector<16x128xbf16>, vector<128x384xbf16>, vector<16x384xf32> -> vector<16x384xf32>
    %141 = vector.extract_strided_slice %137 {offsets = [0, 0], sizes = [16, 128], strides = [1, 1]} : vector<16x384xf32> to vector<16x128xf32>
    %142 = vector.extract_strided_slice %140 {offsets = [0, 0], sizes = [16, 128], strides = [1, 1]} : vector<16x384xf32> to vector<16x128xf32>
    %143 = arith.addf %141, %142 : vector<16x128xf32>
    %144 = arith.negf %143 : vector<16x128xf32>
    %145 = math.exp %144 : vector<16x128xf32>
    %cst_46 = arith.constant 1.000000e+00 : f32
    %146 = vector.broadcast %cst_46 : f32 to vector<16x128xf32>
    %147 = arith.addf %146, %145 : vector<16x128xf32>
    %148 = arith.divf %146, %147 : vector<16x128xf32>
    %149 = vector.extract_strided_slice %137 {offsets = [0, 128], sizes = [16, 128], strides = [1, 1]} : vector<16x384xf32> to vector<16x128xf32>
    %150 = vector.extract_strided_slice %140 {offsets = [0, 128], sizes = [16, 128], strides = [1, 1]} : vector<16x384xf32> to vector<16x128xf32>
    %151 = arith.addf %149, %150 : vector<16x128xf32>
    %152 = arith.negf %151 : vector<16x128xf32>
    %153 = math.exp %152 : vector<16x128xf32>
    %cst_47 = arith.constant 1.000000e+00 : f32
    %154 = vector.broadcast %cst_47 : f32 to vector<16x128xf32>
    %155 = arith.addf %154, %153 : vector<16x128xf32>
    %156 = arith.divf %154, %155 : vector<16x128xf32>
    %157 = vector.extract_strided_slice %137 {offsets = [0, 256], sizes = [16, 128], strides = [1, 1]} : vector<16x384xf32> to vector<16x128xf32>
    %158 = vector.extract_strided_slice %140 {offsets = [0, 256], sizes = [16, 128], strides = [1, 1]} : vector<16x384xf32> to vector<16x128xf32>
    %159 = arith.addf %158, %15 : vector<16x128xf32>
    %160 = arith.mulf %148, %159 : vector<16x128xf32>
    %161 = arith.addf %157, %160 : vector<16x128xf32>
    %162 = math.tanh %161 : vector<16x128xf32>
    %cst_48 = arith.constant 1.000000e+00 : f32
    %163 = vector.broadcast %cst_48 : f32 to vector<16x128xf32>
    %164 = arith.subf %163, %156 : vector<16x128xf32>
    %165 = arith.mulf %164, %162 : vector<16x128xf32>
    %166 = arith.mulf %156, %128 : vector<16x128xf32>
    %167 = arith.addf %165, %166 : vector<16x128xf32>
    %168 = arith.addi %12, %c3_i32 : i32
    %169 = arith.index_cast %168 : i32 to index
    %170 = memref.load %arg1[%169] : memref<8xf32, #tpu.memory_space<smem>>
    %171 = vector.broadcast %170 : f32 to vector<16x128xf32>
    %172 = arith.mulf %171, %167 : vector<16x128xf32>
    %173 = arith.addf %134, %172 : vector<16x128xf32>
    %c4_i32 = arith.constant 4 : i32
    %174 = arith.index_cast %c4_i32 : i32 to index
    %c0_49 = arith.constant 0 : index
    %c0_50 = arith.constant 0 : index
    %175 = vector.load %arg12[%174, %c0_49, %c0_50] : memref<8x16x384xf32, #tpu.memory_space<vmem>>, vector<1x16x384xf32>
    %176 = vector.shape_cast %175 : vector<1x16x384xf32> to vector<16x384xf32>
    %177 = arith.truncf %167 : vector<16x128xf32> to vector<16x128xbf16>
    %c0_51 = arith.constant 0 : index
    %c0_52 = arith.constant 0 : index
    %178 = vector.load %arg6[%c0_51, %c0_52] : memref<128x384xbf16, #tpu.memory_space<vmem>>, vector<128x384xbf16>
    %cst_53 = arith.constant dense<0.000000e+00> : vector<16x384xf32>
    %179 = tpu.matmul %177, %178, %cst_53 {dimension_numbers = #tpu.dot_dimension_numbers<[1], [0], [0], [1], [0, 0, 1, 1], [], []>} : vector<16x128xbf16>, vector<128x384xbf16>, vector<16x384xf32> -> vector<16x384xf32>
    %180 = vector.extract_strided_slice %176 {offsets = [0, 0], sizes = [16, 128], strides = [1, 1]} : vector<16x384xf32> to vector<16x128xf32>
    %181 = vector.extract_strided_slice %179 {offsets = [0, 0], sizes = [16, 128], strides = [1, 1]} : vector<16x384xf32> to vector<16x128xf32>
    %182 = arith.addf %180, %181 : vector<16x128xf32>
    %183 = arith.negf %182 : vector<16x128xf32>
    %184 = math.exp %183 : vector<16x128xf32>
    %cst_54 = arith.constant 1.000000e+00 : f32
    %185 = vector.broadcast %cst_54 : f32 to vector<16x128xf32>
    %186 = arith.addf %185, %184 : vector<16x128xf32>
    %187 = arith.divf %185, %186 : vector<16x128xf32>
    %188 = vector.extract_strided_slice %176 {offsets = [0, 128], sizes = [16, 128], strides = [1, 1]} : vector<16x384xf32> to vector<16x128xf32>
    %189 = vector.extract_strided_slice %179 {offsets = [0, 128], sizes = [16, 128], strides = [1, 1]} : vector<16x384xf32> to vector<16x128xf32>
    %190 = arith.addf %188, %189 : vector<16x128xf32>
    %191 = arith.negf %190 : vector<16x128xf32>
    %192 = math.exp %191 : vector<16x128xf32>
    %cst_55 = arith.constant 1.000000e+00 : f32
    %193 = vector.broadcast %cst_55 : f32 to vector<16x128xf32>
    %194 = arith.addf %193, %192 : vector<16x128xf32>
    %195 = arith.divf %193, %194 : vector<16x128xf32>
    %196 = vector.extract_strided_slice %176 {offsets = [0, 256], sizes = [16, 128], strides = [1, 1]} : vector<16x384xf32> to vector<16x128xf32>
    %197 = vector.extract_strided_slice %179 {offsets = [0, 256], sizes = [16, 128], strides = [1, 1]} : vector<16x384xf32> to vector<16x128xf32>
    %198 = arith.addf %197, %15 : vector<16x128xf32>
    %199 = arith.mulf %187, %198 : vector<16x128xf32>
    %200 = arith.addf %196, %199 : vector<16x128xf32>
    %201 = math.tanh %200 : vector<16x128xf32>
    %cst_56 = arith.constant 1.000000e+00 : f32
    %202 = vector.broadcast %cst_56 : f32 to vector<16x128xf32>
    %203 = arith.subf %202, %195 : vector<16x128xf32>
    %204 = arith.mulf %203, %201 : vector<16x128xf32>
    %205 = arith.mulf %195, %167 : vector<16x128xf32>
    %206 = arith.addf %204, %205 : vector<16x128xf32>
    %207 = arith.addi %12, %c4_i32 : i32
    %208 = arith.index_cast %207 : i32 to index
    %209 = memref.load %arg1[%208] : memref<8xf32, #tpu.memory_space<smem>>
    %210 = vector.broadcast %209 : f32 to vector<16x128xf32>
    %211 = arith.mulf %210, %206 : vector<16x128xf32>
    %212 = arith.addf %173, %211 : vector<16x128xf32>
    %c5_i32 = arith.constant 5 : i32
    %213 = arith.index_cast %c5_i32 : i32 to index
    %c0_57 = arith.constant 0 : index
    %c0_58 = arith.constant 0 : index
    %214 = vector.load %arg12[%213, %c0_57, %c0_58] : memref<8x16x384xf32, #tpu.memory_space<vmem>>, vector<1x16x384xf32>
    %215 = vector.shape_cast %214 : vector<1x16x384xf32> to vector<16x384xf32>
    %216 = arith.truncf %206 : vector<16x128xf32> to vector<16x128xbf16>
    %c0_59 = arith.constant 0 : index
    %c0_60 = arith.constant 0 : index
    %217 = vector.load %arg6[%c0_59, %c0_60] : memref<128x384xbf16, #tpu.memory_space<vmem>>, vector<128x384xbf16>
    %cst_61 = arith.constant dense<0.000000e+00> : vector<16x384xf32>
    %218 = tpu.matmul %216, %217, %cst_61 {dimension_numbers = #tpu.dot_dimension_numbers<[1], [0], [0], [1], [0, 0, 1, 1], [], []>} : vector<16x128xbf16>, vector<128x384xbf16>, vector<16x384xf32> -> vector<16x384xf32>
    %219 = vector.extract_strided_slice %215 {offsets = [0, 0], sizes = [16, 128], strides = [1, 1]} : vector<16x384xf32> to vector<16x128xf32>
    %220 = vector.extract_strided_slice %218 {offsets = [0, 0], sizes = [16, 128], strides = [1, 1]} : vector<16x384xf32> to vector<16x128xf32>
    %221 = arith.addf %219, %220 : vector<16x128xf32>
    %222 = arith.negf %221 : vector<16x128xf32>
    %223 = math.exp %222 : vector<16x128xf32>
    %cst_62 = arith.constant 1.000000e+00 : f32
    %224 = vector.broadcast %cst_62 : f32 to vector<16x128xf32>
    %225 = arith.addf %224, %223 : vector<16x128xf32>
    %226 = arith.divf %224, %225 : vector<16x128xf32>
    %227 = vector.extract_strided_slice %215 {offsets = [0, 128], sizes = [16, 128], strides = [1, 1]} : vector<16x384xf32> to vector<16x128xf32>
    %228 = vector.extract_strided_slice %218 {offsets = [0, 128], sizes = [16, 128], strides = [1, 1]} : vector<16x384xf32> to vector<16x128xf32>
    %229 = arith.addf %227, %228 : vector<16x128xf32>
    %230 = arith.negf %229 : vector<16x128xf32>
    %231 = math.exp %230 : vector<16x128xf32>
    %cst_63 = arith.constant 1.000000e+00 : f32
    %232 = vector.broadcast %cst_63 : f32 to vector<16x128xf32>
    %233 = arith.addf %232, %231 : vector<16x128xf32>
    %234 = arith.divf %232, %233 : vector<16x128xf32>
    %235 = vector.extract_strided_slice %215 {offsets = [0, 256], sizes = [16, 128], strides = [1, 1]} : vector<16x384xf32> to vector<16x128xf32>
    %236 = vector.extract_strided_slice %218 {offsets = [0, 256], sizes = [16, 128], strides = [1, 1]} : vector<16x384xf32> to vector<16x128xf32>
    %237 = arith.addf %236, %15 : vector<16x128xf32>
    %238 = arith.mulf %226, %237 : vector<16x128xf32>
    %239 = arith.addf %235, %238 : vector<16x128xf32>
    %240 = math.tanh %239 : vector<16x128xf32>
    %cst_64 = arith.constant 1.000000e+00 : f32
    %241 = vector.broadcast %cst_64 : f32 to vector<16x128xf32>
    %242 = arith.subf %241, %234 : vector<16x128xf32>
    %243 = arith.mulf %242, %240 : vector<16x128xf32>
    %244 = arith.mulf %234, %206 : vector<16x128xf32>
    %245 = arith.addf %243, %244 : vector<16x128xf32>
    %246 = arith.addi %12, %c5_i32 : i32
    %247 = arith.index_cast %246 : i32 to index
    %248 = memref.load %arg1[%247] : memref<8xf32, #tpu.memory_space<smem>>
    %249 = vector.broadcast %248 : f32 to vector<16x128xf32>
    %250 = arith.mulf %249, %245 : vector<16x128xf32>
    %251 = arith.addf %212, %250 : vector<16x128xf32>
    %c6_i32 = arith.constant 6 : i32
    %252 = arith.index_cast %c6_i32 : i32 to index
    %c0_65 = arith.constant 0 : index
    %c0_66 = arith.constant 0 : index
    %253 = vector.load %arg12[%252, %c0_65, %c0_66] : memref<8x16x384xf32, #tpu.memory_space<vmem>>, vector<1x16x384xf32>
    %254 = vector.shape_cast %253 : vector<1x16x384xf32> to vector<16x384xf32>
    %255 = arith.truncf %245 : vector<16x128xf32> to vector<16x128xbf16>
    %c0_67 = arith.constant 0 : index
    %c0_68 = arith.constant 0 : index
    %256 = vector.load %arg6[%c0_67, %c0_68] : memref<128x384xbf16, #tpu.memory_space<vmem>>, vector<128x384xbf16>
    %cst_69 = arith.constant dense<0.000000e+00> : vector<16x384xf32>
    %257 = tpu.matmul %255, %256, %cst_69 {dimension_numbers = #tpu.dot_dimension_numbers<[1], [0], [0], [1], [0, 0, 1, 1], [], []>} : vector<16x128xbf16>, vector<128x384xbf16>, vector<16x384xf32> -> vector<16x384xf32>
    %258 = vector.extract_strided_slice %254 {offsets = [0, 0], sizes = [16, 128], strides = [1, 1]} : vector<16x384xf32> to vector<16x128xf32>
    %259 = vector.extract_strided_slice %257 {offsets = [0, 0], sizes = [16, 128], strides = [1, 1]} : vector<16x384xf32> to vector<16x128xf32>
    %260 = arith.addf %258, %259 : vector<16x128xf32>
    %261 = arith.negf %260 : vector<16x128xf32>
    %262 = math.exp %261 : vector<16x128xf32>
    %cst_70 = arith.constant 1.000000e+00 : f32
    %263 = vector.broadcast %cst_70 : f32 to vector<16x128xf32>
    %264 = arith.addf %263, %262 : vector<16x128xf32>
    %265 = arith.divf %263, %264 : vector<16x128xf32>
    %266 = vector.extract_strided_slice %254 {offsets = [0, 128], sizes = [16, 128], strides = [1, 1]} : vector<16x384xf32> to vector<16x128xf32>
    %267 = vector.extract_strided_slice %257 {offsets = [0, 128], sizes = [16, 128], strides = [1, 1]} : vector<16x384xf32> to vector<16x128xf32>
    %268 = arith.addf %266, %267 : vector<16x128xf32>
    %269 = arith.negf %268 : vector<16x128xf32>
    %270 = math.exp %269 : vector<16x128xf32>
    %cst_71 = arith.constant 1.000000e+00 : f32
    %271 = vector.broadcast %cst_71 : f32 to vector<16x128xf32>
    %272 = arith.addf %271, %270 : vector<16x128xf32>
    %273 = arith.divf %271, %272 : vector<16x128xf32>
    %274 = vector.extract_strided_slice %254 {offsets = [0, 256], sizes = [16, 128], strides = [1, 1]} : vector<16x384xf32> to vector<16x128xf32>
    %275 = vector.extract_strided_slice %257 {offsets = [0, 256], sizes = [16, 128], strides = [1, 1]} : vector<16x384xf32> to vector<16x128xf32>
    %276 = arith.addf %275, %15 : vector<16x128xf32>
    %277 = arith.mulf %265, %276 : vector<16x128xf32>
    %278 = arith.addf %274, %277 : vector<16x128xf32>
    %279 = math.tanh %278 : vector<16x128xf32>
    %cst_72 = arith.constant 1.000000e+00 : f32
    %280 = vector.broadcast %cst_72 : f32 to vector<16x128xf32>
    %281 = arith.subf %280, %273 : vector<16x128xf32>
    %282 = arith.mulf %281, %279 : vector<16x128xf32>
    %283 = arith.mulf %273, %245 : vector<16x128xf32>
    %284 = arith.addf %282, %283 : vector<16x128xf32>
    %285 = arith.addi %12, %c6_i32 : i32
    %286 = arith.index_cast %285 : i32 to index
    %287 = memref.load %arg1[%286] : memref<8xf32, #tpu.memory_space<smem>>
    %288 = vector.broadcast %287 : f32 to vector<16x128xf32>
    %289 = arith.mulf %288, %284 : vector<16x128xf32>
    %290 = arith.addf %251, %289 : vector<16x128xf32>
    %c7_i32 = arith.constant 7 : i32
    %291 = arith.index_cast %c7_i32 : i32 to index
    %c0_73 = arith.constant 0 : index
    %c0_74 = arith.constant 0 : index
    %292 = vector.load %arg12[%291, %c0_73, %c0_74] : memref<8x16x384xf32, #tpu.memory_space<vmem>>, vector<1x16x384xf32>
    %293 = vector.shape_cast %292 : vector<1x16x384xf32> to vector<16x384xf32>
    %294 = arith.truncf %284 : vector<16x128xf32> to vector<16x128xbf16>
    %c0_75 = arith.constant 0 : index
    %c0_76 = arith.constant 0 : index
    %295 = vector.load %arg6[%c0_75, %c0_76] : memref<128x384xbf16, #tpu.memory_space<vmem>>, vector<128x384xbf16>
    %cst_77 = arith.constant dense<0.000000e+00> : vector<16x384xf32>
    %296 = tpu.matmul %294, %295, %cst_77 {dimension_numbers = #tpu.dot_dimension_numbers<[1], [0], [0], [1], [0, 0, 1, 1], [], []>} : vector<16x128xbf16>, vector<128x384xbf16>, vector<16x384xf32> -> vector<16x384xf32>
    %297 = vector.extract_strided_slice %293 {offsets = [0, 0], sizes = [16, 128], strides = [1, 1]} : vector<16x384xf32> to vector<16x128xf32>
    %298 = vector.extract_strided_slice %296 {offsets = [0, 0], sizes = [16, 128], strides = [1, 1]} : vector<16x384xf32> to vector<16x128xf32>
    %299 = arith.addf %297, %298 : vector<16x128xf32>
    %300 = arith.negf %299 : vector<16x128xf32>
    %301 = math.exp %300 : vector<16x128xf32>
    %cst_78 = arith.constant 1.000000e+00 : f32
    %302 = vector.broadcast %cst_78 : f32 to vector<16x128xf32>
    %303 = arith.addf %302, %301 : vector<16x128xf32>
    %304 = arith.divf %302, %303 : vector<16x128xf32>
    %305 = vector.extract_strided_slice %293 {offsets = [0, 128], sizes = [16, 128], strides = [1, 1]} : vector<16x384xf32> to vector<16x128xf32>
    %306 = vector.extract_strided_slice %296 {offsets = [0, 128], sizes = [16, 128], strides = [1, 1]} : vector<16x384xf32> to vector<16x128xf32>
    %307 = arith.addf %305, %306 : vector<16x128xf32>
    %308 = arith.negf %307 : vector<16x128xf32>
    %309 = math.exp %308 : vector<16x128xf32>
    %cst_79 = arith.constant 1.000000e+00 : f32
    %310 = vector.broadcast %cst_79 : f32 to vector<16x128xf32>
    %311 = arith.addf %310, %309 : vector<16x128xf32>
    %312 = arith.divf %310, %311 : vector<16x128xf32>
    %313 = vector.extract_strided_slice %293 {offsets = [0, 256], sizes = [16, 128], strides = [1, 1]} : vector<16x384xf32> to vector<16x128xf32>
    %314 = vector.extract_strided_slice %296 {offsets = [0, 256], sizes = [16, 128], strides = [1, 1]} : vector<16x384xf32> to vector<16x128xf32>
    %315 = arith.addf %314, %15 : vector<16x128xf32>
    %316 = arith.mulf %304, %315 : vector<16x128xf32>
    %317 = arith.addf %313, %316 : vector<16x128xf32>
    %318 = math.tanh %317 : vector<16x128xf32>
    %cst_80 = arith.constant 1.000000e+00 : f32
    %319 = vector.broadcast %cst_80 : f32 to vector<16x128xf32>
    %320 = arith.subf %319, %312 : vector<16x128xf32>
    %321 = arith.mulf %320, %318 : vector<16x128xf32>
    %322 = arith.mulf %312, %284 : vector<16x128xf32>
    %323 = arith.addf %321, %322 : vector<16x128xf32>
    %324 = arith.addi %12, %c7_i32 : i32
    %325 = arith.index_cast %324 : i32 to index
    %326 = memref.load %arg1[%325] : memref<8xf32, #tpu.memory_space<smem>>
    %327 = vector.broadcast %326 : f32 to vector<16x128xf32>
    %328 = arith.mulf %327, %323 : vector<16x128xf32>
    %329 = arith.addf %290, %328 : vector<16x128xf32>
    %c8_i32_81 = arith.constant 8 : i32
    %c0_82 = arith.constant 0 : index
    %c0_83 = arith.constant 0 : index
    %330 = vector.load %arg10[%c0_82, %c0_83] : memref<16x128xf32, #tpu.memory_space<vmem>>, vector<16x128xf32>
    tpu.vector_store %arg10[%c0_82, %c0_83], %323 {strides = array<i32>} : memref<16x128xf32, #tpu.memory_space<vmem>>, vector<16x128xf32>,
    %c0_84 = arith.constant 0 : index
    %c0_85 = arith.constant 0 : index
    %331 = vector.load %arg11[%c0_84, %c0_85] : memref<16x128xf32, #tpu.memory_space<vmem>>, vector<16x128xf32>
    tpu.vector_store %arg11[%c0_84, %c0_85], %329 {strides = array<i32>} : memref<16x128xf32, #tpu.memory_space<vmem>>, vector<16x128xf32>,
    %c0_i32_86 = arith.constant 0 : i32
    %332 = arith.cmpi eq, %arg0, %c0_i32_86 : i32
    %333 = arith.extui %332 : i1 to i32
    %c0_i32_87 = arith.constant 0 : i32
    %334 = arith.cmpi ne, %333, %c0_i32_87 : i32
    scf.if %334 {
      %c0_88 = arith.constant 0 : index
      %c0_89 = arith.constant 0 : index
      %335 = vector.load %arg11[%c0_88, %c0_89] : memref<16x128xf32, #tpu.memory_space<vmem>>, vector<16x128xf32>
      %336 = vector.extract_strided_slice %335 {offsets = [8, 0], sizes = [8, 128], strides = [1, 1]} : vector<16x128xf32> to vector<8x128xf32>
      %337 = vector.extract_strided_slice %335 {offsets = [0, 0], sizes = [8, 128], strides = [1, 1]} : vector<16x128xf32> to vector<8x128xf32>
      %338 = arith.subf %336, %337 : vector<8x128xf32>
      %c0_90 = arith.constant 0 : index
      %c0_91 = arith.constant 0 : index
      %339 = vector.load %arg8[%c0_90, %c0_91] : memref<128x1xf32, #tpu.memory_space<vmem>>, vector<128x1xf32>
      %cst_92 = arith.constant dense<0.000000e+00> : vector<8x1xf32>
      %340 = tpu.matmul %338, %339, %cst_92 {dimension_numbers = #tpu.dot_dimension_numbers<[1], [0], [0], [1], [0, 0, 1, 1], [], []>} : vector<8x128xf32>, vector<128x1xf32>, vector<8x1xf32> -> vector<8x1xf32>
      %cst_93 = arith.constant -5.000000e+01 : f32
      %cst_94 = arith.constant 5.000000e+01 : f32
      %341 = vector.broadcast %cst_93 : f32 to vector<8x1xf32>
      %342 = arith.maximumf %341, %340 : vector<8x1xf32>
      %343 = vector.broadcast %cst_94 : f32 to vector<8x1xf32>
      %344 = arith.minimumf %343, %342 : vector<8x1xf32>
      %345 = math.exp %344 : vector<8x1xf32>
      %cst_95 = arith.constant 1.000000e+00 : f32
      %346 = vector.broadcast %cst_95 : f32 to vector<8x1xf32>
      %347 = arith.addf %346, %345 : vector<8x1xf32>
      %cst_96 = arith.constant 1.000000e+00 : f32
      %348 = vector.broadcast %cst_96 : f32 to vector<8x1xf32>
      %349 = arith.divf %348, %347 : vector<8x1xf32>
      %cst_97 = arith.constant 0.899999976 : f32
      %350 = vector.broadcast %cst_97 : f32 to vector<8x1xf32>
      %351 = arith.mulf %350, %349 : vector<8x1xf32>
      %cst_98 = arith.constant 5.000000e-02 : f32
      %352 = vector.broadcast %cst_98 : f32 to vector<8x1xf32>
      %353 = arith.addf %352, %351 : vector<8x1xf32>
      %c0_99 = arith.constant 0 : index
      %c0_100 = arith.constant 0 : index
      %354 = vector.load %arg9[%c0_99, %c0_100] : memref<8x1xf32, #tpu.memory_space<vmem>>, vector<8x1xf32>
      tpu.vector_store %arg9[%c0_99, %c0_100], %353 {strides = array<i32>} : memref<8x1xf32, #tpu.memory_space<vmem>>, vector<8x1xf32>,
    } else {
    }
    return
  }
  func.func @transform_0(%arg0: i32) -> i32 {
    %c0_i32 = arith.constant 0 : i32
    %c0_i32_0 = arith.constant 0 : i32
    return %c0_i32 : i32
  }
  func.func @transform_1(%arg0: i32) -> (i32, i32, i32) {
    %c0_i32 = arith.constant 0 : i32
    %c0_i32_0 = arith.constant 0 : i32
    %c0_i32_1 = arith.constant 0 : i32
    return %arg0, %c0_i32, %c0_i32_0 : i32, i32, i32
  }
  func.func @transform_2(%arg0: i32) -> (i32, i32) {
    %c0_i32 = arith.constant 0 : i32
    %c0_i32_0 = arith.constant 0 : i32
    %c0_i32_1 = arith.constant 0 : i32
    return %c0_i32, %c0_i32_0 : i32, i32
  }
  func.func @transform_3(%arg0: i32) -> (i32, i32) {
    %c0_i32 = arith.constant 0 : i32
    %c0_i32_0 = arith.constant 0 : i32
    %c0_i32_1 = arith.constant 0 : i32
    return %c0_i32, %c0_i32_0 : i32, i32
  }
  func.func @transform_4(%arg0: i32) -> (i32, i32) {
    %c0_i32 = arith.constant 0 : i32
    %c0_i32_0 = arith.constant 0 : i32
    %c0_i32_1 = arith.constant 0 : i32
    return %c0_i32, %c0_i32_0 : i32, i32
  }
  func.func @transform_5(%arg0: i32) -> (i32, i32) {
    %c0_i32 = arith.constant 0 : i32
    %c0_i32_0 = arith.constant 0 : i32
    %c0_i32_1 = arith.constant 0 : i32
    return %c0_i32, %c0_i32_0 : i32, i32
  }
  func.func @transform_6(%arg0: i32) -> (i32, i32) {
    %c0_i32 = arith.constant 0 : i32
    %c0_i32_0 = arith.constant 0 : i32
    %c0_i32_1 = arith.constant 0 : i32
    return %c0_i32, %c0_i32_0 : i32, i32
  }
  func.func @transform_7(%arg0: i32) -> (i32, i32) {
    %c0_i32 = arith.constant 0 : i32
    %c0_i32_0 = arith.constant 0 : i32
    %c0_i32_1 = arith.constant 0 : i32
    return %c0_i32, %c0_i32_0 : i32, i32
  }
  func.func @transform_8(%arg0: i32) -> (i32, i32) {
    %c0_i32 = arith.constant 0 : i32
    %c0_i32_0 = arith.constant 0 : i32
    %c0_i32_1 = arith.constant 0 : i32
    return %c0_i32, %c0_i32_0 : i32, i32
  }
}

</mosaic_0001>

<bundles_post_ra>
// kernel: tpu_custom_call.1
= control target key start
LH: loop header
LB: loop body
LE: loop exit
PB: predicated region body
PF: predicated region fallthrough
CT: control target
= control target key end

     0   :  { %13 = vsyncpa [#allocation7], 0  ;;  %s3348_s0 = inlined_call_operand.vmem [shape: f32[8], index: 0, kind: input, shape index: {}]   ;;  %s3349_s1 = inlined_call_operand.hbm [shape: bf16[8,16,41], index: 1, kind: input, shape index: {}]   ;;  %s3350_s2 = inlined_call_operand.vmem [shape: f32[16,128], index: 2, kind: input, shape index: {}]   ;;  %s3351_s3 = inlined_call_operand.vmem [shape: bf16[41,384], index: 3, kind: input, shape index: {}]   ;;  %s3352_s4 = inlined_call_operand.vmem [shape: f32[1,384], index: 4, kind: input, shape index: {}]   ;;  %s3353_s5 = inlined_call_operand.hbm [shape: bf16[128,384], index: 5, kind: input, shape index: {}]   ;;  %s3354_s6 = inlined_call_operand.vmem [shape: f32[1,128], index: 6, kind: input, shape index: {}]   ;;  %s3355_s7 = inlined_call_operand.vmem [shape: f32[128,1], index: 7, kind: input, shape index: {}]   ;;  %s3356_s8 = inlined_call_operand.vmem [shape: f32[8,1], index: 8, kind: output, shape index: {}]  }
   0x1   :  { %14 = vsyncpa [#allocation6], 0  ;;  %s21_s29 = sshll.u32 %s3348_s0, 4  ;;  %s22_s29 = int_to_ptr.vmem [resolvable:$true] %s21_s29 }
   0x2   :  { %15 = vsyncpa [#allocation10], 0  ;;  %s29_s10 = sshll.u32 %s3349_s1, 4  ;;  %s2416_s11 = smov [#allocation5]   ;;  %s30_s10 = int_to_ptr.hbm [resolvable:$true] %s29_s10 }
   0x3   :  { %24 = dma.vmem_to_smem %s22_s29, 16, %s2416_s11, [#allocation7]  }
   0x4   :  { %s2417_s12 = smov [#allocation8]   ;;  %s2418_s14 = smov 64  }
   0x5   :  { %s31_s13 = sshll.u32 %s2417_s12, 4  ;;  %s2419_s15 = smov 4   ;;  %s32_s13 = int_to_ptr.vmem [resolvable:$true] %s31_s13 }
   0x6   :  { %37 = dma.hbm_to_vmem [thread:$0]  %s30_s10, 1024, %s32_s13, [#allocation6], %s2418_s14, %s2418_s14, %s2419_s15  }
   0x7   :  { %s48_s18 = sshll.u32 %s3353_s5, 4  ;;  %s2420_s0 = smov [#allocation9]   ;;  %s49_s18 = int_to_ptr.hbm [resolvable:$true] %s48_s18 }
   0x8   :  { %s50_s19 = sshll.u32 %s2420_s0, 4  ;;  %s2421_s20 = smov 192   ;;  %s51_s19 = int_to_ptr.vmem [resolvable:$true] %s50_s19 }
   0x9   :  { %s2422_s21 = smov 12  }
   0xa   :  { %56 = dma.hbm_to_vmem [thread:$0]  %s49_s18, 3072, %s51_s19, [#allocation10], %s2421_s20, %s2421_s20, %s2422_s21  }
   0xb   :  { %2410 = dma.done.wait [#allocation7], 16  }
   0xc   :  { %2411 = vsyncadd [#allocation7], 4294967280 }
   0xd   :  { %2412 = dma.done.wait [#allocation6], 1024  }
   0xe   :  { %2413 = vsyncadd [#allocation6], 4294966272 }
   0xf   :  { %2414 = dma.done.wait [#allocation10], 3072  }
  0x10   :  { %2415 = vsyncadd [#allocation10], 4294964224 }
  0x11   :  { %73 = sfence }
  0x12   :  { %v2085_v0 = vld [vmem:[#allocation9 + $0xa8] sm:$0xf]  ;;  %v2174_v1 = vld [vmem:[#allocation9 + $0xb0] sm:$0xf0]  ;;  %v2073_v2 = vld [vmem:[#allocation9 + $0x90] sm:$0xf] }
  0x13   :  { %v2478_v3 = vor.u32 %v2174_v1, %v2085_v0  ;;  %v2171_v4 = vld [vmem:[#allocation9 + $0x98] sm:$0xf0]  ;;  %v2061_v6 = vld [vmem:[#allocation9 + $0x78] sm:$0xf]  ;;  %v2168_v7 = vld [vmem:[#allocation9 + $0x80] sm:$0xf0] }
  0x14   :  { %v2481_v5 = vor.u32 %v2171_v4, %v2073_v2  ;;  %v1965_v8 = vld [vmem:[%s3351_s3 + $0x30] sm:$0xf]  ;;  %v2150_v9 = vld [vmem:[%s3351_s3 + $0x38] sm:$0x10]  ;;  %vm231_vm0 = vcmask 1043456   ;;  %vm232_vm1 = vcmask 1044480   ;;  %v2490_v13 = vor.u32 %v2168_v7, %v2061_v6 }
  0x15   :  { %615 = vmatpush.bf16.msra.mxu3 %v2478_v3  ;;  %v1966_v10 = vor.u32 %v2150_v9, %v1965_v8  ;;  %v2423_v11 = vmov 65535   ;;  %v2049_v14 = vld [vmem:[#allocation9 + $0x60] sm:$0xf]  ;;  %v2165_v16 = vld [vmem:[#allocation9 + $0x68] sm:$0xf0]  ;;  %vm206_vm2 = vcmask 334848  }
  0x16   :  { %v233_v12 = vsel %vm231_vm0, 4294967295, %v2423_v11  ;;  %v1953_v18 = vld [vmem:[%s3351_s3 + $0x18] sm:$0xf]  ;;  %v2147_v19 = vld [vmem:[%s3351_s3 + $0x20] sm:$0xf0]  ;;  %v2502_v21 = vor.u32 %v2165_v16, %v2049_v14  ;;  %v2555_v57 = vld [vmem:[%s3350_s2 + $0x8] sm:$0xff] }
  0x17   :  { %v2492_v15 = vsel %vm232_vm1, %v233_v12, 0  ;;  %v1954_v20 = vor.u32 %v2147_v19, %v1953_v18  ;;  %v1941_v22 = vld [vmem:[%s3351_s3] sm:$0xf]  ;;  %v2144_v23 = vld [vmem:[%s3351_s3 + $0x8] sm:$0xf0]  ;;  %s3247_s9 = sld [smem:[#allocation5]] }
  0x18   :  { %v236_v17 = vand.u32 %v1966_v10, %v2492_v15  ;;  %v2037_v24 = vld [vmem:[#allocation9 + $0x48] sm:$0xf]  ;;  %v2162_v25 = vld [vmem:[#allocation9 + $0x50] sm:$0xf0]  ;;  %v2173_v26 = vld [vmem:[#allocation9 + $0xac] sm:$0xf]  ;;  %v1942_v28 = vor.u32 %v2144_v23, %v1941_v22 }
  0x19   :  { %616 = vmatpush.bf16.msra.mxu3 %v2481_v5  ;;  %v2087_v27 = vld [vmem:[#allocation9 + $0xb4] sm:$0xf0]  ;;  %v2511_v29 = vor.u32 %v2162_v25, %v2037_v24  ;;  %v2025_v30 = vld [vmem:[#allocation9 + $0x30] sm:$0xf]  ;;  %v2159_v31 = vld [vmem:[#allocation9 + $0x38] sm:$0xf0] }
  0x1a   :  { %249 = vmatpush.bf16.msra.mxu0 %v236_v17  ;;  %v2513_v32 = vor.u32 %v2173_v26, %v2087_v27  ;;  %v2515_v33 = vld [vmem:[#allocation8] sm:$0xff]  ;;  %v2170_v34 = vld [vmem:[#allocation9 + $0x94] sm:$0xf]  ;;  %v2518_v36 = vor.u32 %v2159_v31, %v2025_v30  ;;  %v2013_v39 = vld [vmem:[#allocation9 + $0x18] sm:$0xf]  ;;  %s3274_s18 = sld [smem:[#allocation5 + $0x2]] }
  0x1b   :  { %v2075_v35 = vld [vmem:[#allocation9 + $0x9c] sm:$0xf0]  ;;  %v2149_v37 = vld [vmem:[%s3351_s3 + $0x34] sm:$0xf]  ;;  %v2156_v40 = vld [vmem:[#allocation9 + $0x20] sm:$0xf0] }
  0x1c   :  { %v1967_v38 = vld [vmem:[%s3351_s3 + $0x3c] sm:$0x10]  ;;  %v2527_v42 = vor.u32 %v2170_v34, %v2075_v35  ;;  %v2167_v43 = vld [vmem:[#allocation9 + $0x7c] sm:$0xf]  ;;  %v2063_v44 = vld [vmem:[#allocation9 + $0x84] sm:$0xf0]  ;;  %v2533_v46 = vor.u32 %v2156_v40, %v2013_v39 }
  0x1d   :  { %617 = vmatpush.bf16.msra.mxu3 %v2490_v13  ;;  %v1970_v41 = vor.u32 %v2149_v37, %v1967_v38  ;;  %v2001_v47 = vld [vmem:[#allocation9] sm:$0xf]  ;;  %v2153_v48 = vld [vmem:[#allocation9 + $0x8] sm:$0xf0]  ;;  %v2146_v49 = vld [vmem:[%s3351_s3 + $0x1c] sm:$0xf]  ;;  %v2542_v51 = vor.u32 %v2167_v43, %v2063_v44 }
  0x1e   :  { %250 = vmatpush.bf16.msra.mxu0 %v1954_v20  ;;  %v1955_v50 = vld [vmem:[%s3351_s3 + $0x24] sm:$0xf0]  ;;  %v2164_v53 = vld [vmem:[#allocation9 + $0x64] sm:$0xf]  ;;  %v2051_v54 = vld [vmem:[#allocation9 + $0x6c] sm:$0xf0]  ;;  %v2545_v55 = vor.u32 %v2153_v48, %v2001_v47 }
  0x1f   :  { %v239_v45 = vand.u32 %v1970_v41, %v2492_v15  ;;  %v1958_v52 = vor.u32 %v2146_v49, %v1955_v50  ;;  %v2550_v56 = vld [vmem:[%s3350_s2] sm:$0xff]  ;;  %v2093_v58 = vld [vmem:[#allocation9 + $0xb0] sm:$0xf]  ;;  %v2175_v59 = vld [vmem:[#allocation9 + $0xb8] sm:$0xf0]  ;;  %v2558_v60 = vor.u32 %v2164_v53, %v2051_v54  ;;  %s3300_s20 = sld [smem:[#allocation5 + $0x4]] }
  0x20   :  { %v2143_v61 = vld [vmem:[%s3351_s3 + $0x4] sm:$0xf]  ;;  %v1943_v62 = vld [vmem:[%s3351_s3 + $0xc] sm:$0xf0]  ;;  %v2568_v63 = vpack.c.bf16 %v2555_v57, %v2550_v56  ;;  %v2161_v0 = vld [vmem:[#allocation9 + $0x4c] sm:$0xf]  ;;  %v2571_v4 = vor.u32 %v2175_v59, %v2093_v58 }
  0x21   :  { %618 = vmatpush.bf16.msra.mxu3 %v2502_v21  ;;  %298 = vmatpush.bf16.msra.mxu1 %v239_v45  ;;  %v2039_v1 = vld [vmem:[#allocation9 + $0x54] sm:$0xf0]  ;;  %v1946_v2 = vor.u32 %v2143_v61, %v1943_v62  ;;  %v2172_v7 = vld [vmem:[#allocation9 + $0xa0] sm:$0xf0]  ;;  %v2158_v9 = vld [vmem:[#allocation9 + $0x34] sm:$0xf] }
  0x22   :  { %251 = vmatpush.bf16.msra.mxu0 %v1942_v28  ;;  %v2081_v6 = vld [vmem:[#allocation9 + $0x98] sm:$0xf]  ;;  %v2575_v8 = vor.u32 %v2161_v0, %v2039_v1  ;;  %v2027_v10 = vld [vmem:[#allocation9 + $0x3c] sm:$0xf0]  ;;  %v2169_v14 = vld [vmem:[#allocation9 + $0x88] sm:$0xf0] }
  0x23   :  { %v2579_v11 = vor.u32 %v2172_v7, %v2081_v6  ;;  %v2069_v12 = vld [vmem:[#allocation9 + $0x80] sm:$0xf]  ;;  %v2585_v16 = vor.u32 %v2158_v9, %v2027_v10  ;;  %v2155_v17 = vld [vmem:[#allocation9 + $0x1c] sm:$0xf]  ;;  %v2015_v18 = vld [vmem:[#allocation9 + $0x24] sm:$0xf0] }
  0x24   :  { %v1973_v19 = vld [vmem:[%s3351_s3 + $0x38] sm:$0xf]  ;;  %v2151_v20 = vld [vmem:[%s3351_s3 + $0x40] sm:$0x10]  ;;  %v2594_v22 = vor.u32 %v2169_v14, %v2069_v12  ;;  %v2057_v24 = vld [vmem:[#allocation9 + $0x68] sm:$0xf]  ;;  %v2598_v26 = vor.u32 %v2155_v17, %v2015_v18 }
  0x25   :  { %619 = vmatpush.bf16.msra.mxu3 %v2511_v29  ;;  %1975 = vmatmul.msk.bf16.vlgmr.msra.gmra.mxu0 %vm206_vm2, %v2515_v33  ;;  %v1974_v23 = vor.u32 %v2151_v20, %v1973_v19  ;;  %v2166_v25 = vld [vmem:[#allocation9 + $0x70] sm:$0xf0]  ;;  %v2152_v28 = vld [vmem:[#allocation9 + $0x4] sm:$0xf]  ;;  %v2003_v30 = vld [vmem:[#allocation9 + $0xc] sm:$0xf0] }
  0x26   :  { %781 = vmatpush.bf16.msrb.mxu0 %v2513_v32  ;;  %299 = vmatpush.bf16.msra.mxu1 %v1958_v52  ;;  %v2602_v31 = vor.u32 %v2166_v25, %v2057_v24  ;;  %v2045_v34 = vld [vmem:[#allocation9 + $0x50] sm:$0xf]  ;;  %v2163_v35 = vld [vmem:[#allocation9 + $0x58] sm:$0xf0]  ;;  %v1961_v37 = vld [vmem:[%s3351_s3 + $0x20] sm:$0xf]  ;;  %v2612_v38 = vor.u32 %v2152_v28, %v2003_v30 }
  0x27   :  { %v242_v27 = vand.u32 %v1974_v23, %v2492_v15  ;;  %v2148_v15 = vld [vmem:[%s3351_s3 + $0x28] sm:$0xf0]  ;;  %v2615_v40 = vor.u32 %v2163_v35, %v2045_v34  ;;  %v2033_v41 = vld [vmem:[#allocation9 + $0x38] sm:$0xf]  ;;  %v2160_v43 = vld [vmem:[#allocation9 + $0x40] sm:$0xf0] }
  0x28   :  { %v1962_v39 = vor.u32 %v2148_v15, %v1961_v37  ;;  %v1949_v44 = vld [vmem:[%s3351_s3 + $0x8] sm:$0xf]  ;;  %v2145_v45 = vld [vmem:[%s3351_s3 + $0x10] sm:$0xf0]  ;;  %v2627_v48 = vor.u32 %v2160_v43, %v2033_v41  ;;  %v2021_v49 = vld [vmem:[#allocation9 + $0x20] sm:$0xf] }
  0x29   :  { %620 = vmatpush.bf16.msra.mxu3 %v2518_v36  ;;  %347 = vmatpush.bf16.msra.mxu2 %v242_v27  ;;  %v1950_v47 = vor.u32 %v2145_v45, %v1949_v44  ;;  %v2157_v50 = vld [vmem:[#allocation9 + $0x28] sm:$0xf0]  ;;  %v2009_v53 = vld [vmem:[#allocation9 + $0x8] sm:$0xf]  ;;  %v2154_v54 = vld [vmem:[#allocation9 + $0x10] sm:$0xf0] }
  0x2a   :  { %782 = vmatpush.bf16.msrb.mxu0 %v2527_v42  ;;  %300 = vmatpush.bf16.msra.mxu1 %v1946_v2  ;;  %v2635_v52 = vor.u32 %v2157_v50, %v2021_v49  ;;  %v2641_v58 = vor.u32 %v2154_v54, %v2009_v53  ;;  %v2136_v59 = vld [vmem:[#allocation8 + $0x8] sm:$0xff]  ;;  %v2138_v61 = vld [vmem:[#allocation8 + $0x18] sm:$0xff]  ;;  %v2139_v62 = vld [vmem:[#allocation8 + $0x20] sm:$0xff]  ;;  %s3311_s21 = sld [smem:[#allocation5 + $0x5]] }
  0x2b   :  { %v2140_v2 = vld [vmem:[#allocation8 + $0x28] sm:$0xff]  ;;  %v2141_v19 = vld [vmem:[#allocation8 + $0x30] sm:$0xff]  ;;  %v2142_v43 = vld [vmem:[#allocation8 + $0x38] sm:$0xff]  ;;  %s3317_s1 = sld [smem:[#allocation5 + $0x6]] }
  0x2c   :  { %s3328_s5 = sld [smem:[#allocation5 + $0x7]] }
  0x2d   :  { %621 = vmatpush.bf16.msra.mxu3 %v2533_v46  ;;  %1983 = vmatmul.msk.bf16.vlgmr.msra.gmra.mxu1 %vm206_vm2, %v2515_v33 }
  0x2e   :  { %783 = vmatpush.bf16.msrb.mxu0 %v2542_v51  ;;  %795 = vmatpush.bf16.msrb.mxu1 %v2571_v4 }
  0x2f   :  { %348 = vmatpush.bf16.msra.mxu2 %v1962_v39 }
  0x31   :  { %622 = vmatpush.bf16.msra.mxu3 %v2545_v55 }
  0x32   :  { %784 = vmatpush.bf16.msrb.mxu0 %v2558_v60  ;;  %796 = vmatpush.bf16.msrb.mxu1 %v2579_v11 }
  0x33   :  { %349 = vmatpush.bf16.msra.mxu2 %v1950_v47 }
  0x34   :  { %623 = vmatmul.bf16.vlgmr.msra.gmra.mxu3 %v2568_v63 }
  0x35   :  { %629 = vmatpush.bf16.msrb.mxu3 %v2513_v32  ;;  %1976 = vmatmul.msk.bf16.gmra.mxu0 %vm206_vm2, %v2136_v59 }
  0x36   :  { %785 = vmatpush.bf16.msrb.mxu0 %v2575_v8  ;;  %797 = vmatpush.bf16.msrb.mxu1 %v2594_v22 }
  0x37   :  { %920 = vmatpush.bf16.msrb.mxu2 %v2478_v3 }
  0x38   :  { %1991 = vmatmul.msk.bf16.vlgmr.msra.gmra.mxu2 %vm206_vm2, %v2515_v33  ;;  %v2137_v33 = vld [vmem:[#allocation8 + $0x10] sm:$0xff] }
  0x39   :  { %630 = vmatpush.bf16.msrb.mxu3 %v2527_v42 }
  0x3a   :  { %786 = vmatpush.bf16.msrb.mxu0 %v2585_v16  ;;  %798 = vmatpush.bf16.msrb.mxu1 %v2602_v31 }
  0x3b   :  { %921 = vmatpush.bf16.msrb.mxu2 %v2481_v5 }
  0x3d   :  { %631 = vmatpush.bf16.msrb.mxu3 %v2542_v51  ;;  %1984 = vmatmul.msk.bf16.gmra.mxu1 %vm206_vm2, %v2136_v59 }
  0x3e   :  { %787 = vmatpush.bf16.msrb.mxu0 %v2598_v26  ;;  %799 = vmatpush.bf16.msrb.mxu1 %v2615_v40 }
  0x3f   :  { %922 = vmatpush.bf16.msrb.mxu2 %v2490_v13 }
  0x41   :  { %632 = vmatpush.bf16.msrb.mxu3 %v2558_v60 }
  0x42   :  { %788 = vmatpush.bf16.msrb.mxu0 %v2612_v38  ;;  %800 = vmatpush.bf16.msrb.mxu1 %v2627_v48 }
  0x43   :  { %923 = vmatpush.bf16.msrb.mxu2 %v2502_v21 }
  0x45   :  { %633 = vmatpush.bf16.msrb.mxu3 %v2575_v8  ;;  %1977 = vmatmul.msk.bf16.gmra.mxu0 %vm206_vm2, %v2137_v33 }
  0x46   :  { %948 = vmatpush.bf16.msra.mxu0 %v2571_v4  ;;  %801 = vmatpush.bf16.msrb.mxu1 %v2635_v52 }
  0x47   :  { %924 = vmatpush.bf16.msrb.mxu2 %v2511_v29 }
  0x48   :  { %1992 = vmatmul.msk.bf16.gmra.mxu2 %vm206_vm2, %v2136_v59 }
  0x49   :  { %634 = vmatpush.bf16.msrb.mxu3 %v2585_v16 }
  0x4a   :  { %949 = vmatpush.bf16.msra.mxu0 %v2579_v11  ;;  %802 = vmatpush.bf16.msrb.mxu1 %v2641_v58 }
  0x4b   :  { %925 = vmatpush.bf16.msrb.mxu2 %v2518_v36 }
  0x4d   :  { %635 = vmatpush.bf16.msrb.mxu3 %v2598_v26  ;;  %1985 = vmatmul.msk.bf16.gmra.mxu1 %vm206_vm2, %v2137_v33 }
  0x4e   :  { %950 = vmatpush.bf16.msra.mxu0 %v2594_v22  ;;  %1073 = vmatpush.bf16.msra.mxu1 %v2478_v3 }
  0x4f   :  { %926 = vmatpush.bf16.msrb.mxu2 %v2533_v46 }
  0x51   :  { %636 = vmatpush.bf16.msrb.mxu3 %v2612_v38 }
  0x52   :  { %951 = vmatpush.bf16.msra.mxu0 %v2602_v31  ;;  %1074 = vmatpush.bf16.msra.mxu1 %v2481_v5 }
  0x53   :  { %927 = vmatpush.bf16.msrb.mxu2 %v2545_v55 }
  0x54   :  { %637 = vmatmul.bf16.vlgmr.msrb.gmra.mxu3 %v2568_v63 }
  0x55   :  { %643 = vmatpush.bf16.msra.mxu3 %v2571_v4  ;;  %1978 = vmatmul.msk.bf16.gmra.mxu0 %vm206_vm2, %v2138_v61 }
  0x56   :  { %952 = vmatpush.bf16.msra.mxu0 %v2615_v40  ;;  %1075 = vmatpush.bf16.msra.mxu1 %v2490_v13 }
  0x57   :  { %1087 = vmatpush.bf16.msra.mxu2 %v2513_v32 }
  0x58   :  { %1993 = vmatmul.msk.bf16.gmra.mxu2 %vm206_vm2, %v2137_v33 }
  0x59   :  { %644 = vmatpush.bf16.msra.mxu3 %v2579_v11 }
  0x5a   :  { %953 = vmatpush.bf16.msra.mxu0 %v2627_v48  ;;  %1076 = vmatpush.bf16.msra.mxu1 %v2502_v21 }
  0x5b   :  { %1088 = vmatpush.bf16.msra.mxu2 %v2527_v42 }
  0x5d   :  { %645 = vmatpush.bf16.msra.mxu3 %v2594_v22  ;;  %1986 = vmatmul.msk.bf16.gmra.mxu1 %vm206_vm2, %v2138_v61 }
  0x5e   :  { %954 = vmatpush.bf16.msra.mxu0 %v2635_v52  ;;  %1077 = vmatpush.bf16.msra.mxu1 %v2511_v29 }
  0x5f   :  { %1089 = vmatpush.bf16.msra.mxu2 %v2542_v51 }
  0x61   :  { %646 = vmatpush.bf16.msra.mxu3 %v2602_v31 }
  0x62   :  { %955 = vmatpush.bf16.msra.mxu0 %v2641_v58  ;;  %1078 = vmatpush.bf16.msra.mxu1 %v2518_v36 }
  0x63   :  { %1090 = vmatpush.bf16.msra.mxu2 %v2558_v60 }
  0x65   :  { %647 = vmatpush.bf16.msra.mxu3 %v2615_v40  ;;  %1979 = vmatmul.msk.bf16.gmra.mxu0 %vm206_vm2, %v2139_v62 }
  0x66   :  { %1079 = vmatpush.bf16.msra.mxu1 %v2533_v46 }
  0x67   :  { %1091 = vmatpush.bf16.msra.mxu2 %v2575_v8 }
  0x68   :  { %1994 = vmatmul.msk.bf16.gmra.mxu2 %vm206_vm2, %v2138_v61 }
  0x69   :  { %648 = vmatpush.bf16.msra.mxu3 %v2627_v48 }
  0x6a   :  { %1080 = vmatpush.bf16.msra.mxu1 %v2545_v55 }
  0x6b   :  { %1092 = vmatpush.bf16.msra.mxu2 %v2585_v16 }
  0x6d   :  { %649 = vmatpush.bf16.msra.mxu3 %v2635_v52  ;;  %1987 = vmatmul.msk.bf16.gmra.mxu1 %vm206_vm2, %v2139_v62 }
  0x6f   :  { %1093 = vmatpush.bf16.msra.mxu2 %v2598_v26 }
  0x71   :  { %650 = vmatpush.bf16.msra.mxu3 %v2641_v58 }
  0x73   :  { %1094 = vmatpush.bf16.msra.mxu2 %v2612_v38 }
  0x74   :  { %651 = vmatmul.bf16.vlgmr.msra.gmra.mxu3 %v2568_v63  ;;  %v2713_v63 = vld [vmem:[%s3352_s4] sm:$0x7]  ;;  %s3258_s4 = sld [smem:[#allocation5 + $0x1]] }
  0x75   :  { %767 = vmatpush.bf16.msrb.mxu3 %v2478_v3  ;;  %v2716_v1 = vperm.slane %v2713_v63, 0  ;;  %1980 = vmatmul.msk.bf16.gmra.mxu0 %vm206_vm2, %v2140_v2  ;;  %v2724_v23 = vperm.slane %v2713_v63, 1 }
  0x78   :  { %1995 = vmatmul.msk.bf16.gmra.mxu2 %vm206_vm2, %v2139_v62 }
  0x79   :  { %768 = vmatpush.bf16.msrb.mxu3 %v2481_v5 }
  0x7d   :  { %769 = vmatpush.bf16.msrb.mxu3 %v2490_v13  ;;  %1988 = vmatmul.msk.bf16.gmra.mxu1 %vm206_vm2, %v2140_v2 }
  0x81   :  { %770 = vmatpush.bf16.msrb.mxu3 %v2502_v21 }
  0x85   :  { %771 = vmatpush.bf16.msrb.mxu3 %v2511_v29  ;;  %1981 = vmatmul.msk.bf16.gmra.mxu0 %vm206_vm2, %v2141_v19 }
  0x88   :  { %1996 = vmatmul.msk.bf16.gmra.mxu2 %vm206_vm2, %v2140_v2 }
  0x89   :  { %772 = vmatpush.bf16.msrb.mxu3 %v2518_v36 }
  0x8d   :  { %773 = vmatpush.bf16.msrb.mxu3 %v2533_v46  ;;  %1989 = vmatmul.msk.bf16.gmra.mxu1 %vm206_vm2, %v2141_v19 }
  0x91   :  { %774 = vmatpush.bf16.msrb.mxu3 %v2545_v55 }
  0x95   :  { %934 = vmatpush.bf16.msra.mxu3 %v2513_v32  ;;  %1982 = vmatmul.msk.bf16.gmra.mxu0 %vm206_vm2, %v2142_v43 }
  0x98   :  { %1997 = vmatmul.msk.bf16.gmra.mxu2 %vm206_vm2, %v2141_v19 }
  0x99   :  { %935 = vmatpush.bf16.msra.mxu3 %v2527_v42 }
  0x9d   :  { %936 = vmatpush.bf16.msra.mxu3 %v2542_v51  ;;  %1990 = vmatmul.msk.bf16.gmra.mxu1 %vm206_vm2, %v2142_v43 }
  0xa1   :  { %937 = vmatpush.bf16.msra.mxu3 %v2558_v60 }
  0xa2   :  { %v253_v0 = vpop.f32.mrf.mxu0 }
  0xa3   :  { %v254_v7 = vadd.f32 %v253_v0, %v2716_v1 }
  0xa5   :  { %938 = vmatpush.bf16.msra.mxu3 %v2575_v8 }
  0xa8   :  { %1998 = vmatmul.msk.bf16.gmra.mxu2 %vm206_vm2, %v2142_v43 }
  0xa9   :  { %939 = vmatpush.bf16.msra.mxu3 %v2585_v16 }
  0xaa   :  { %v255_v10 = vpop.f32.mrf.mxu0  ;;  %v302_v20 = vpop.f32.mrf.mxu1 }
  0xab   :  { %v256_v14 = vadd.f32 %v255_v10, %v2716_v1  ;;  %v303_v27 = vadd.f32 %v302_v20, %v2724_v23 }
  0xad   :  { %940 = vmatpush.bf16.msra.mxu3 %v2598_v26 }
  0xb1   :  { %941 = vmatpush.bf16.msra.mxu3 %v2612_v38 }
  0xb2   :  { %v304_v35 = vpop.f32.mrf.mxu1 }
  0xb3   :  { %v305_v39 = vadd.f32 %v304_v35, %v2724_v23 }
  0xb7   :  { %v624_v6 = vpop.f32.mrf.mxu3 }
  0xb8   :  { %v657_v9 = vadd.f32 %v624_v6, %v254_v7 }
  0xba   :  { %v2095_v12 = vmul.f32 -1.442695, %v657_v9 }
  0xbb   :  { %v351_v19 = vpop.f32.mrf.mxu2 }
  0xbc   :  { %2185 = vpow2.f32 %v2095_v12 }
  0xbf   :  { %v626_v17 = vpop.f32.mrf.mxu3 }
  0xc0   :  { %v658_v18 = vadd.f32 %v626_v17, %v256_v14 }
  0xc2   :  { %v2096_v24 = vmul.f32 -1.442695, %v658_v18  ;;  %v2186_v25 = vpop.eup %2185  ;;  %v2751_v18 = vld [vmem:[%s3354_s6] ss:$0 sm:$0xff] }
  0xc3   :  { %v665_v28 = vadd.f32 1.0, %v2186_v25  ;;  %v2754_v25 = vperm.slane %v2713_v63, 2 }
  0xc4   :  { %2187 = vpow2.f32 %v2096_v24 }
  0xc5   :  { %2189 = vrcp.f32 %v665_v28  ;;  %vm672_vm3 = vweird.f32 %v665_v28  ;;  %v678_v7 = vand.u32 2147483648, %v665_v28  ;;  %v676_v10 = vand.u32 2147483647, %v665_v28 }
  0xc7   :  { %v679_v20 = vor.u32 1.1754944e-38, %v678_v7  ;;  %vm677_vm6 = vcmp.eq.f32.partialorder %v676_v10, 8.507059e+37 }
  0xca   :  { %v2188_v15 = vpop.eup %2187 }
  0xcb   :  { %v666_v41 = vadd.f32 1.0, %v2188_v15  ;;  %v2190_v45 = vpop.eup %2189 }
  0xcc   :  { %v668_v54 = vmul.f32 %v2190_v45, %v665_v28  ;;  %vm673_vm4 = vweird.f32 %v2190_v45 }
  0xcd   :  { %vm2744_vm5 = vmor %vm672_vm3, %vm673_vm4  ;;  %vm687_vm7 = vweird.f32 %v666_v41  ;;  %v693_v43 = vand.u32 2147483648, %v666_v41 }
  0xce   :  { %v669_v59 = vsub.f32 1.0, %v668_v54 }
  0xd0   :  { %v670_v0 = vmul.f32 %v2190_v45, %v669_v59  ;;  %v694_v59 = vor.u32 1.1754944e-38, %v693_v43 }
  0xd2   :  { %v671_v9 = vadd.f32 %v2190_v45, %v670_v0 }
  0xd7   :  { %v638_v30 = vpop.f32.mrf.mxu3 }
  0xd8   :  { %v697_v34 = vadd.f32 %v638_v30, %v303_v27  ;;  %v675_v27 = vsel %vm2744_vm5, %v2190_v45, %v671_v9 }
  0xda   :  { %v2097_v37 = vmul.f32 -1.442695, %v697_v34 }
  0xdc   :  { %2191 = vpow2.f32 %v2097_v37 }
  0xdd   :  { %2193 = vrcp.f32 %v666_v41 }
  0xdf   :  { %v640_v44 = vpop.f32.mrf.mxu3 }
  0xe0   :  { %v698_v47 = vadd.f32 %v640_v44, %v305_v39  ;;  %v680_v39 = vsel %vm677_vm6, %v679_v20, %v675_v27  ;;  %v352_v44 = vadd.f32 %v351_v19, %v2754_v25 }
  0xe2   :  { %v2192_v49 = vpop.eup %2191  ;;  %v2098_v50 = vmul.f32 -1.442695, %v698_v47 }
  0xe3   :  { %v2734_v53 = vadd.f32 1.0, %v2192_v49  ;;  %v2194_v33 = vpop.eup %2193  ;;  %v691_v49 = vand.u32 2147483647, %v666_v41 }
  0xe4   :  { %2195 = vpow2.f32 %v2098_v50  ;;  %v683_v2 = vmul.f32 %v2194_v33, %v666_v41  ;;  %vm688_vm8 = vweird.f32 %v2194_v33  ;;  %v353_v41 = vpop.f32.mrf.mxu2 }
  0xe5   :  { %2197 = vrcp.f32 %v2734_v53  ;;  %vm2762_vm9 = vmor %vm687_vm7, %vm688_vm8  ;;  %vm692_vm10 = vcmp.eq.f32.partialorder %v691_v49, 8.507059e+37  ;;  %vm712_vm11 = vweird.f32 %v2734_v53  ;;  %v718_v9 = vand.u32 2147483648, %v2734_v53 }
  0xe6   :  { %v684_v12 = vsub.f32 1.0, %v683_v2  ;;  %v354_v20 = vadd.f32 %v353_v41, %v2754_v25 }
  0xe8   :  { %v685_v28 = vmul.f32 %v2194_v33, %v684_v12  ;;  %v716_v12 = vand.u32 2147483647, %v2734_v53 }
  0xea   :  { %v2196_v61 = vpop.eup %2195  ;;  %v686_v47 = vadd.f32 %v2194_v33, %v685_v28  ;;  %vm717_vm1 = vcmp.eq.f32.partialorder %v716_v12, 8.507059e+37 }
  0xeb   :  { %v2737_v62 = vadd.f32 1.0, %v2196_v61  ;;  %v2739_v6 = vpop.eup %2197 }
  0xec   :  { %v708_v14 = vmul.f32 %v2739_v6, %v2734_v53  ;;  %v690_v0 = vsel %vm2762_vm9, %v2194_v33, %v686_v47  ;;  %vm713_vm12 = vweird.f32 %v2739_v6 }
  0xed   :  { %2199 = vrcp.f32 %v2737_v62  ;;  %v695_v17 = vsel %vm692_vm10, %v694_v59, %v690_v0  ;;  %vm2774_vm14 = vmor %vm712_vm11, %vm713_vm12  ;;  %v733_v19 = vand.u32 2147483648, %v2737_v62  ;;  %vm727_vm15 = vweird.f32 %v2737_v62 }
  0xee   :  { %v709_v30 = vsub.f32 1.0, %v708_v14  ;;  %v731_v28 = vand.u32 2147483647, %v2737_v62 }
  0xf0   :  { %v710_v45 = vmul.f32 %v2739_v6, %v709_v30  ;;  %v719_v30 = vor.u32 1.1754944e-38, %v718_v9  ;;  %vm732_vm2 = vcmp.eq.f32.partialorder %v731_v28, 8.507059e+37 }
  0xf2   :  { %v711_v2 = vadd.f32 %v2739_v6, %v710_v45 }
  0xf3   :  { %v2200_v24 = vpop.eup %2199 }
  0xf4   :  { %v723_v34 = vmul.f32 %v2200_v24, %v2737_v62  ;;  %vm728_vm13 = vweird.f32 %v2200_v24  ;;  %v715_v53 = vsel %vm2774_vm14, %v2739_v6, %v711_v2 }
  0xf5   :  { %vm729_vm0 = vmor %vm727_vm15, %vm728_vm13 }
  0xf6   :  { %v724_v15 = vsub.f32 1.0, %v723_v34 }
  0xf7   :  { %v652_v35 = vpop.f32.mrf.mxu3 }
  0xf8   :  { %v737_v37 = vadd.f32 %v2751_v18, %v652_v35  ;;  %v725_v54 = vmul.f32 %v2200_v24, %v724_v15  ;;  %v2785_v35 = vpop.f32.mrf.mxu0  ;;  %v734_v15 = vor.u32 1.1754944e-38, %v733_v19 }
  0xfa   :  { %v739_v63 = vmul.f32 %v737_v37, %v680_v39  ;;  %v726_v14 = vadd.f32 %v2200_v24, %v725_v54  ;;  %v720_v39 = vsel %vm717_vm1, %v719_v30, %v715_v53 }
  0xfb   :  { %v749_v6 = vmul.f32 %v720_v39, %v2550_v56 }
  0xfc   :  { %v741_v61 = vadd.f32 %v739_v63, %v352_v44  ;;  %v730_v37 = vsel %vm729_vm0, %v2200_v24, %v726_v14  ;;  %v745_v63 = vsub.f32 1.0, %v720_v39 }
  0xfd   :  { %v735_v44 = vsel %vm732_vm2, %v734_v15, %v730_v37 }
  0xfe   :  { %2201 = vtanh.f32 %v741_v61  ;;  %v746_v62 = vsub.f32 1.0, %v735_v44  ;;  %v750_v50 = vmul.f32 %v735_v44, %v2555_v57  ;;  %v307_v57 = vpop.f32.mrf.mxu1 }
  0xff   :  { %v654_v7 = vpop.f32.mrf.mxu3  ;;  %v308_v44 = vadd.f32 %v307_v57, %v2724_v23 }
 0x100   :  { %v738_v10 = vadd.f32 %v2751_v18, %v654_v7  ;;  %v2789_v54 = vpop.f32.mrf.mxu0 }
 0x102   :  { %v740_v27 = vmul.f32 %v738_v10, %v695_v17 }
 0x104   :  { %v742_v34 = vadd.f32 %v740_v27, %v354_v20  ;;  %v2202_v43 = vpop.eup %2201 }
 0x105   :  { %v747_v47 = vmul.f32 %v2202_v43, %v745_v63 }
 0x106   :  { %2203 = vtanh.f32 %v742_v34  ;;  %v309_v2 = vpop.f32.mrf.mxu1 }
 0x107   :  { %v2791_v59 = vadd.f32 %v749_v6, %v747_v47 }
 0x108   :  { %v2800_v56 = vpop.f32.mrf.mxu0 }
 0x109   :  { %3365 = vst [vmem:[#allocation14_spill] sm:$0xff] %v2791_v59 }
 0x10c   :  { %v2204_v49 = vpop.eup %2203 }
 0x10d   :  { %v748_v45 = vmul.f32 %v2204_v49, %v746_v62 }
 0x10e   :  { %v2827_v7 = vpop.f32.mrf.mxu1 }
 0x10f   :  { %v2793_v24 = vadd.f32 %v750_v50, %v748_v45  ;;  %v259_v45 = vadd.f32 %v2785_v35, %v2716_v1  ;;  %v310_v50 = vadd.f32 %v309_v2, %v2724_v23 }
 0x110   :  { %v2811_v0 = vpop.f32.mrf.mxu0 }
 0x111   :  { %3366 = vst [vmem:[#allocation15_spill] sm:$0xff] %v2793_v24  ;;  %v766_v61 = vpack.c.bf16 %v2793_v24, %v2791_v59 }
 0x113   :  { %775 = vmatmul.bf16.vlgmr.msrb.gmra.mxu3 %v766_v61  ;;  %789 = vmatmul.bf16.vlgmr.msrb.gmra.mxu0 %v766_v61 }
 0x114   :  { %803 = vmatmul.bf16.vlgmr.msrb.gmra.mxu1 %v766_v61  ;;  %1101 = vmatpush.bf16.msrb.mxu3 %v2571_v4 }
 0x115   :  { %1226 = vmatpush.bf16.msrb.mxu0 %v2478_v3  ;;  %1240 = vmatpush.bf16.msrb.mxu1 %v2513_v32 }
 0x116   :  { %v2831_v10 = vpop.f32.mrf.mxu1 }
 0x118   :  { %1102 = vmatpush.bf16.msrb.mxu3 %v2579_v11  ;;  %v2819_v41 = vpop.f32.mrf.mxu0 }
 0x119   :  { %1227 = vmatpush.bf16.msrb.mxu0 %v2481_v5  ;;  %1241 = vmatpush.bf16.msrb.mxu1 %v2527_v42 }
 0x11c   :  { %1103 = vmatpush.bf16.msrb.mxu3 %v2594_v22 }
 0x11d   :  { %1228 = vmatpush.bf16.msrb.mxu0 %v2490_v13  ;;  %1242 = vmatpush.bf16.msrb.mxu1 %v2542_v51 }
 0x11e   :  { %v2835_v14 = vpop.f32.mrf.mxu1 }
 0x11f   :  { %3369 = vst [vmem:[#allocation18_spill] sm:$0xff] %v2835_v14 }
 0x120   :  { %1104 = vmatpush.bf16.msrb.mxu3 %v2602_v31  ;;  %v2829_v9 = vpop.f32.mrf.mxu0 }
 0x121   :  { %1229 = vmatpush.bf16.msrb.mxu0 %v2502_v21  ;;  %1243 = vmatpush.bf16.msrb.mxu1 %v2558_v60  ;;  %3367 = vst [vmem:[#allocation16_spill] sm:$0xff] %v2829_v9 }
 0x124   :  { %1105 = vmatpush.bf16.msrb.mxu3 %v2615_v40 }
 0x125   :  { %1230 = vmatpush.bf16.msrb.mxu0 %v2511_v29  ;;  %1244 = vmatpush.bf16.msrb.mxu1 %v2575_v8 }
 0x126   :  { %v2839_v33 = vpop.f32.mrf.mxu1 }
 0x127   :  { %3371 = vst [vmem:[#allocation20_spill] sm:$0xff] %v2839_v33 }
 0x128   :  { %1106 = vmatpush.bf16.msrb.mxu3 %v2627_v48  ;;  %v2833_v12 = vpop.f32.mrf.mxu0 }
 0x129   :  { %1231 = vmatpush.bf16.msrb.mxu0 %v2518_v36  ;;  %1245 = vmatpush.bf16.msrb.mxu1 %v2585_v16  ;;  %3368 = vst [vmem:[#allocation17_spill] sm:$0xff] %v2833_v12 }
 0x12c   :  { %1107 = vmatpush.bf16.msrb.mxu3 %v2635_v52 }
 0x12d   :  { %1232 = vmatpush.bf16.msrb.mxu0 %v2533_v46  ;;  %1246 = vmatpush.bf16.msrb.mxu1 %v2598_v26 }
 0x12e   :  { %v2843_v20 = vpop.f32.mrf.mxu1 }
 0x12f   :  { %3373 = vst [vmem:[#allocation22_spill] sm:$0xff] %v2843_v20 }
 0x130   :  { %1108 = vmatpush.bf16.msrb.mxu3 %v2641_v58  ;;  %v2837_v17 = vpop.f32.mrf.mxu0 }
 0x131   :  { %1233 = vmatpush.bf16.msrb.mxu0 %v2545_v55  ;;  %1247 = vmatpush.bf16.msrb.mxu1 %v2612_v38  ;;  %3370 = vst [vmem:[#allocation19_spill] sm:$0xff] %v2837_v17 }
 0x136   :  { %v2847_v28 = vpop.f32.mrf.mxu1 }
 0x137   :  { %3375 = vst [vmem:[#allocation24_spill] sm:$0xff] %v2847_v28 }
 0x138   :  { %v2841_v19 = vpop.f32.mrf.mxu0 }
 0x139   :  { %3372 = vst [vmem:[#allocation21_spill] sm:$0xff] %v2841_v19 }
 0x13e   :  { %v2851_v30 = vpop.f32.mrf.mxu1 }
 0x13f   :  { %3377 = vst [vmem:[#allocation26_spill] sm:$0xff] %v2851_v30 }
 0x140   :  { %v2845_v27 = vpop.f32.mrf.mxu0 }
 0x141   :  { %3374 = vst [vmem:[#allocation23_spill] sm:$0xff] %v2845_v27 }
 0x146   :  { %v2855_v37 = vpop.f32.mrf.mxu1 }
 0x147   :  { %3379 = vst [vmem:[#allocation28_spill] sm:$0xff] %v2855_v37 }
 0x148   :  { %v2849_v53 = vpop.f32.mrf.mxu0 }
 0x149   :  { %3376 = vst [vmem:[#allocation25_spill] sm:$0xff] %v2849_v53 }
 0x14e   :  { %v2859_v39 = vpop.f32.mrf.mxu1 }
 0x14f   :  { %3381 = vst [vmem:[#allocation30_spill] sm:$0xff] %v2859_v39 }
 0x150   :  { %v2853_v34 = vpop.f32.mrf.mxu0 }
 0x151   :  { %3378 = vst [vmem:[#allocation27_spill] sm:$0xff] %v2853_v34 }
 0x156   :  { %v2864_v63 = vpop.f32.mrf.mxu1 }
 0x157   :  { %3383 = vst [vmem:[#allocation32_spill] sm:$0xff] %v2864_v63  ;;  %v261_v63 = vadd.f32 %v2789_v54, %v2716_v1 }
 0x158   :  { %v2857_v15 = vpop.f32.mrf.mxu0 }
 0x159   :  { %3380 = vst [vmem:[#allocation29_spill] sm:$0xff] %v2857_v15 }
 0x15e   :  { %v2869_v34 = vpop.f32.mrf.mxu1 }
 0x15f   :  { %3384 = vst [vmem:[#allocation33_spill] sm:$0xff] %v2869_v34 }
 0x160   :  { %v2861_v43 = vpop.f32.mrf.mxu0 }
 0x161   :  { %3382 = vst [vmem:[#allocation31_spill] sm:$0xff] %v2861_v43 }
 0x190   :  { %v790_v47 = vpop.f32.mrf.mxu0 }
 0x191   :  { %v849_v62 = vadd.f32 %v790_v47, %v308_v44 }
 0x193   :  { %v2101_v49 = vmul.f32 -1.442695, %v849_v62 }
 0x195   :  { %2205 = vpow2.f32 %v2101_v49 }
 0x196   :  { %v776_v6 = vpop.f32.mrf.mxu3 }
 0x197   :  { %v809_v61 = vadd.f32 %v776_v6, %v259_v45  ;;  %v2875_v6 = vpop.f32.mrf.mxu1 }
 0x198   :  { %v792_v15 = vpop.f32.mrf.mxu0  ;;  %3385 = vst [vmem:[#allocation34_spill] sm:$0xff] %v2875_v6  ;;  %v356_v6 = vpop.f32.mrf.mxu2 }
 0x199   :  { %v2099_v39 = vmul.f32 -1.442695, %v809_v61  ;;  %v850_v43 = vadd.f32 %v792_v15, %v310_v50 }
 0x19b   :  { %2207 = vpow2.f32 %v2099_v39  ;;  %v2102_v57 = vmul.f32 -1.442695, %v850_v43  ;;  %v2206_v44 = vpop.eup %2205 }
 0x19c   :  { %v2873_v53 = vadd.f32 1.0, %v2206_v44 }
 0x19d   :  { %2209 = vpow2.f32 %v2102_v57 }
 0x19e   :  { %v778_v47 = vpop.f32.mrf.mxu3  ;;  %vm864_vm11 = vweird.f32 %v2873_v53 }
 0x19f   :  { %v810_v62 = vadd.f32 %v778_v47, %v261_v63  ;;  %v804_v57 = vpop.f32.mrf.mxu1 }
 0x1a0   :  { %v889_v19 = vadd.f32 %v2751_v18, %v804_v57 }
 0x1a1   :  { %v2208_v35 = vpop.eup %2207  ;;  %v2100_v2 = vmul.f32 -1.442695, %v810_v62 }
 0x1a2   :  { %v817_v45 = vadd.f32 1.0, %v2208_v35 }
 0x1a3   :  { %v2210_v49 = vpop.eup %2209  ;;  %2211 = vpow2.f32 %v2100_v2 }
 0x1a4   :  { %2213 = vrcp.f32 %v817_v45  ;;  %v2877_v15 = vadd.f32 1.0, %v2210_v49  ;;  %v830_v62 = vand.u32 2147483648, %v817_v45  ;;  %v828_v2 = vand.u32 2147483647, %v817_v45 }
 0x1a5   :  { %2215 = vrcp.f32 %v2873_v53  ;;  %vm824_vm4 = vweird.f32 %v817_v45 }
 0x1a6   :  { %2217 = vrcp.f32 %v2877_v15  ;;  %v831_v37 = vor.u32 1.1754944e-38, %v830_v62  ;;  %vm829_vm6 = vcmp.eq.f32.partialorder %v828_v2, 8.507059e+37  ;;  %vm879_vm15 = vweird.f32 %v2877_v15 }
 0x1a9   :  { %v2212_v54 = vpop.eup %2211 }
 0x1aa   :  { %v2214_v39 = vpop.eup %2213  ;;  %v818_v43 = vadd.f32 1.0, %v2212_v54 }
 0x1ab   :  { %v2881_v63 = vpop.eup %2215  ;;  %v820_v50 = vmul.f32 %v2214_v39, %v817_v45  ;;  %vm825_vm3 = vweird.f32 %v2214_v39 }
 0x1ac   :  { %2219 = vrcp.f32 %v818_v43  ;;  %v2883_v61 = vpop.eup %2217  ;;  %v860_v47 = vmul.f32 %v2881_v63, %v2873_v53  ;;  %vm826_vm5 = vmor %vm824_vm4, %vm825_vm3  ;;  %v845_v9 = vand.u32 2147483648, %v818_v43  ;;  %vm839_vm8 = vweird.f32 %v818_v43 }
 0x1ad   :  { %v821_v44 = vsub.f32 1.0, %v820_v50  ;;  %v875_v49 = vmul.f32 %v2883_v61, %v2877_v15  ;;  %vm865_vm9 = vweird.f32 %v2881_v63  ;;  %vm880_vm13 = vweird.f32 %v2883_v61 }
 0x1ae   :  { %v861_v27 = vsub.f32 1.0, %v860_v47  ;;  %v843_v47 = vand.u32 2147483647, %v818_v43  ;;  %vm866_vm14 = vmor %vm864_vm11, %vm865_vm9 }
 0x1af   :  { %v822_v35 = vmul.f32 %v2214_v39, %v821_v44  ;;  %v876_v28 = vsub.f32 1.0, %v875_v49  ;;  %v357_v44 = vadd.f32 %v356_v6, %v2754_v25  ;;  %vm881_vm0 = vmor %vm879_vm15, %vm880_vm13 }
 0x1b0   :  { %v862_v33 = vmul.f32 %v2881_v63, %v861_v27  ;;  %vm844_vm12 = vcmp.eq.f32.partialorder %v843_v47, 8.507059e+37 }
 0x1b1   :  { %v823_v54 = vadd.f32 %v2214_v39, %v822_v35  ;;  %v806_v35 = vpop.f32.mrf.mxu1  ;;  %v877_v62 = vmul.f32 %v2883_v61, %v876_v28 }
 0x1b2   :  { %v2220_v34 = vpop.eup %2219 }
 0x1b3   :  { %v835_v50 = vmul.f32 %v2220_v34, %v818_v43  ;;  %v827_v30 = vsel %vm826_vm5, %v2214_v39, %v823_v54  ;;  %vm840_vm7 = vweird.f32 %v2220_v34  ;;  %v878_v6 = vadd.f32 %v2883_v61, %v877_v62 }
 0x1b4   :  { %v832_v17 = vsel %vm829_vm6, %v831_v37, %v827_v30  ;;  %v890_v30 = vadd.f32 %v2751_v18, %v806_v35  ;;  %v863_v37 = vadd.f32 %v2881_v63, %v862_v33  ;;  %vm841_vm10 = vmor %vm839_vm8, %vm840_vm7  ;;  %v885_v39 = vand.u32 2147483648, %v2877_v15 }
 0x1b5   :  { %v891_v20 = vmul.f32 %v889_v19, %v832_v17  ;;  %v836_v12 = vsub.f32 1.0, %v835_v50  ;;  %v358_v17 = vpop.f32.mrf.mxu2  ;;  %v846_v19 = vor.u32 1.1754944e-38, %v845_v9 }
 0x1b6   :  { %v359_v33 = vadd.f32 %v358_v17, %v2754_v25  ;;  %v867_v43 = vsel %vm866_vm14, %v2881_v63, %v863_v37  ;;  %v886_v54 = vor.u32 1.1754944e-38, %v885_v39 }
 0x1b7   :  { %v837_v45 = vmul.f32 %v2220_v34, %v836_v12  ;;  %v893_v14 = vadd.f32 %v891_v20, %v357_v44  ;;  %v870_v12 = vand.u32 2147483648, %v2873_v53  ;;  %v868_v20 = vand.u32 2147483647, %v2873_v53 }
 0x1b8   :  { %v882_v53 = vsel %vm881_vm0, %v2883_v61, %v878_v6 }
 0x1b9   :  { %v838_v57 = vadd.f32 %v2220_v34, %v837_v45  ;;  %2221 = vtanh.f32 %v893_v14  ;;  %v871_v2 = vor.u32 1.1754944e-38, %v870_v12  ;;  %vm869_vm1 = vcmp.eq.f32.partialorder %v868_v20, 8.507059e+37 }
 0x1bb   :  { %v842_v27 = vsel %vm841_vm10, %v2220_v34, %v838_v57  ;;  %v883_v34 = vand.u32 2147483647, %v2877_v15  ;;  %v872_v50 = vsel %vm869_vm1, %v871_v2, %v867_v43  ;;  %v264_v2 = vadd.f32 %v2800_v56, %v2716_v1 }
 0x1bc   :  { %v847_v28 = vsel %vm844_vm12, %v846_v19, %v842_v27  ;;  %v897_v35 = vsub.f32 1.0, %v872_v50  ;;  %v901_v63 = vmul.f32 %v872_v50, %v2791_v59 }
 0x1bd   :  { %v892_v9 = vmul.f32 %v890_v30, %v847_v28  ;;  %vm884_vm2 = vcmp.eq.f32.partialorder %v883_v34, 8.507059e+37  ;;  %v2924_v17 = vpop.f32.mrf.mxu2 }
 0x1be   :  { %v887_v44 = vsel %vm884_vm2, %v886_v54, %v882_v53 }
 0x1bf   :  { %v894_v49 = vadd.f32 %v892_v9, %v359_v33  ;;  %v2222_v14 = vpop.eup %2221  ;;  %v898_v47 = vsub.f32 1.0, %v887_v44  ;;  %v902_v15 = vmul.f32 %v887_v44, %v2793_v24 }
 0x1c0   :  { %v899_v45 = vmul.f32 %v2222_v14, %v897_v35 }
 0x1c1   :  { %2223 = vtanh.f32 %v894_v49  ;;  %v313_v49 = vadd.f32 %v2827_v7, %v2724_v23 }
 0x1c2   :  { %v2909_v30 = vadd.f32 %v901_v63, %v899_v45  ;;  %v266_v45 = vadd.f32 %v2811_v0, %v2716_v1 }
 0x1c5   :  { %v2935_v19 = vpop.f32.mrf.mxu2 }
 0x1c7   :  { %v2224_v62 = vpop.eup %2223 }
 0x1c8   :  { %v900_v57 = vmul.f32 %v2224_v62, %v898_v47  ;;  %v315_v47 = vadd.f32 %v2831_v10, %v2724_v23 }
 0x1ca   :  { %v2911_v37 = vadd.f32 %v902_v15, %v900_v57 }
 0x1cc   :  { %v919_v61 = vpack.c.bf16 %v2911_v37, %v2909_v30 }
 0x1cd   :  { %v2943_v12 = vpop.f32.mrf.mxu2 }
 0x1ce   :  { %928 = vmatmul.bf16.vlgmr.msrb.gmra.mxu2 %v919_v61  ;;  %942 = vmatmul.bf16.vlgmr.msra.gmra.mxu3 %v919_v61 }
 0x1cf   :  { %956 = vmatmul.bf16.vlgmr.msra.gmra.mxu0 %v919_v61  ;;  %1254 = vmatpush.bf16.msrb.mxu2 %v2571_v4 }
 0x1d0   :  { %1379 = vmatpush.bf16.msra.mxu3 %v2478_v3  ;;  %1393 = vmatpush.bf16.msra.mxu0 %v2513_v32 }
 0x1d3   :  { %1255 = vmatpush.bf16.msrb.mxu2 %v2579_v11 }
 0x1d4   :  { %1380 = vmatpush.bf16.msra.mxu3 %v2481_v5  ;;  %1394 = vmatpush.bf16.msra.mxu0 %v2527_v42 }
 0x1d5   :  { %v2945_v27 = vpop.f32.mrf.mxu2 }
 0x1d7   :  { %1256 = vmatpush.bf16.msrb.mxu2 %v2594_v22 }
 0x1d8   :  { %1381 = vmatpush.bf16.msra.mxu3 %v2490_v13  ;;  %1395 = vmatpush.bf16.msra.mxu0 %v2542_v51 }
 0x1db   :  { %1257 = vmatpush.bf16.msrb.mxu2 %v2602_v31 }
 0x1dc   :  { %1382 = vmatpush.bf16.msra.mxu3 %v2502_v21  ;;  %1396 = vmatpush.bf16.msra.mxu0 %v2558_v60 }
 0x1dd   :  { %v2947_v20 = vpop.f32.mrf.mxu2 }
 0x1df   :  { %1258 = vmatpush.bf16.msrb.mxu2 %v2615_v40 }
 0x1e0   :  { %1383 = vmatpush.bf16.msra.mxu3 %v2511_v29  ;;  %1397 = vmatpush.bf16.msra.mxu0 %v2575_v8 }
 0x1e3   :  { %1259 = vmatpush.bf16.msrb.mxu2 %v2627_v48 }
 0x1e4   :  { %1384 = vmatpush.bf16.msra.mxu3 %v2518_v36  ;;  %1398 = vmatpush.bf16.msra.mxu0 %v2585_v16 }
 0x1e5   :  { %v2949_v28 = vpop.f32.mrf.mxu2 }
 0x1e7   :  { %1260 = vmatpush.bf16.msrb.mxu2 %v2635_v52 }
 0x1e8   :  { %1385 = vmatpush.bf16.msra.mxu3 %v2533_v46  ;;  %1399 = vmatpush.bf16.msra.mxu0 %v2598_v26 }
 0x1eb   :  { %1261 = vmatpush.bf16.msrb.mxu2 %v2641_v58 }
 0x1ec   :  { %1386 = vmatpush.bf16.msra.mxu3 %v2545_v55  ;;  %1400 = vmatpush.bf16.msra.mxu0 %v2612_v38 }
 0x1ed   :  { %v2951_v6 = vpop.f32.mrf.mxu2 }
 0x1f5   :  { %v2953_v39 = vpop.f32.mrf.mxu2 }
 0x1f6   :  { %3386 = vst [vmem:[#allocation35_spill] sm:$0xff] %v2953_v39 }
 0x1fd   :  { %v2955_v33 = vpop.f32.mrf.mxu2 }
 0x1fe   :  { %3387 = vst [vmem:[#allocation36_spill] sm:$0xff] %v2955_v33 }
 0x205   :  { %v2957_v9 = vpop.f32.mrf.mxu2 }
 0x206   :  { %3388 = vst [vmem:[#allocation37_spill] sm:$0xff] %v2957_v9 }
 0x20d   :  { %v2959_v43 = vpop.f32.mrf.mxu2 }
 0x20e   :  { %3389 = vst [vmem:[#allocation38_spill] sm:$0xff] %v2959_v43 }
 0x215   :  { %v2961_v34 = vpop.f32.mrf.mxu2 }
 0x216   :  { %3390 = vst [vmem:[#allocation39_spill] sm:$0xff] %v2961_v34 }
 0x251   :  { %v929_v53 = vpop.f32.mrf.mxu2  ;;  %v943_v54 = vpop.f32.mrf.mxu3 }
 0x252   :  { %v962_v50 = vadd.f32 %v929_v53, %v264_v2  ;;  %v1002_v14 = vadd.f32 %v943_v54, %v313_v49 }
 0x254   :  { %v2104_v44 = vmul.f32 -1.442695, %v962_v50  ;;  %v2106_v35 = vmul.f32 -1.442695, %v1002_v14 }
 0x256   :  { %2225 = vpow2.f32 %v2104_v44 }
 0x257   :  { %2227 = vpow2.f32 %v2106_v35 }
 0x259   :  { %v931_v62 = vpop.f32.mrf.mxu2  ;;  %v945_v57 = vpop.f32.mrf.mxu3 }
 0x25a   :  { %v963_v56 = vadd.f32 %v931_v62, %v266_v45  ;;  %v1003_v63 = vadd.f32 %v945_v57, %v315_v47  ;;  %v957_v47 = vpop.f32.mrf.mxu0 }
 0x25c   :  { %v2226_v15 = vpop.eup %2225  ;;  %v2105_v7 = vmul.f32 -1.442695, %v963_v56  ;;  %v2107_v2 = vmul.f32 -1.442695, %v1003_v63 }
 0x25d   :  { %v2228_v61 = vpop.eup %2227  ;;  %v970_v34 = vadd.f32 1.0, %v2226_v15 }
 0x25e   :  { %v1010_v49 = vadd.f32 1.0, %v2228_v61  ;;  %2229 = vpow2.f32 %v2105_v7 }
 0x25f   :  { %2231 = vrcp.f32 %v970_v34  ;;  %v983_v62 = vand.u32 2147483648, %v970_v34  ;;  %v981_v63 = vand.u32 2147483647, %v970_v34  ;;  %vm977_vm4 = vweird.f32 %v970_v34 }
 0x260   :  { %2233 = vrcp.f32 %v1010_v49  ;;  %v1023_v9 = vand.u32 2147483648, %v1010_v49  ;;  %vm1017_vm8 = vweird.f32 %v1010_v49 }
 0x261   :  { %2235 = vpow2.f32 %v2107_v2  ;;  %v984_v2 = vor.u32 1.1754944e-38, %v983_v62  ;;  %vm982_vm6 = vcmp.eq.f32.partialorder %v981_v63, 8.507059e+37 }
 0x264   :  { %v2230_v53 = vpop.eup %2229 }
 0x265   :  { %v2232_v54 = vpop.eup %2231  ;;  %v971_v0 = vadd.f32 1.0, %v2230_v53  ;;  %v1042_v53 = vadd.f32 %v2751_v18, %v957_v47 }
 0x266   :  { %v2234_v50 = vpop.eup %2233  ;;  %v973_v14 = vmul.f32 %v2232_v54, %v970_v34  ;;  %vm978_vm3 = vweird.f32 %v2232_v54  ;;  %v1021_v34 = vand.u32 2147483647, %v1010_v49 }
 0x267   :  { %v2236_v10 = vpop.eup %2235  ;;  %v1013_v44 = vmul.f32 %v2234_v50, %v1010_v49  ;;  %2237 = vrcp.f32 %v971_v0  ;;  %vm979_vm5 = vmor %vm977_vm4, %vm978_vm3  ;;  %vm1018_vm7 = vweird.f32 %v2234_v50  ;;  %vm992_vm11 = vweird.f32 %v971_v0 }
 0x268   :  { %v974_v35 = vsub.f32 1.0, %v973_v14  ;;  %v2971_v45 = vadd.f32 1.0, %v2236_v10  ;;  %vm2978_vm9 = vmor %vm1017_vm8, %vm1018_vm7  ;;  %vm1022_vm12 = vcmp.eq.f32.partialorder %v1021_v34, 8.507059e+37 }
 0x269   :  { %v1014_v57 = vsub.f32 1.0, %v1013_v44 }
 0x26a   :  { %v975_v56 = vmul.f32 %v2232_v54, %v974_v35  ;;  %2239 = vrcp.f32 %v2971_v45  ;;  %v362_v35 = vadd.f32 %v2924_v17, %v2754_v25  ;;  %vm1032_vm0 = vweird.f32 %v2971_v45 }
 0x26b   :  { %v1015_v15 = vmul.f32 %v2234_v50, %v1014_v57 }
 0x26c   :  { %v976_v7 = vadd.f32 %v2232_v54, %v975_v56  ;;  %v998_v56 = vand.u32 2147483648, %v971_v0 }
 0x26d   :  { %v2238_v61 = vpop.eup %2237  ;;  %v1016_v59 = vadd.f32 %v2234_v50, %v1015_v15  ;;  %v959_v15 = vpop.f32.mrf.mxu0 }
 0x26e   :  { %v980_v24 = vsel %vm979_vm5, %v2232_v54, %v976_v7  ;;  %v988_v14 = vmul.f32 %v2238_v61, %v971_v0  ;;  %vm993_vm10 = vweird.f32 %v2238_v61  ;;  %v999_v49 = vor.u32 1.1754944e-38, %v998_v56 }
 0x26f   :  { %v985_v10 = vsel %vm982_vm6, %v984_v2, %v980_v24  ;;  %v996_v24 = vand.u32 2147483647, %v971_v0  ;;  %v1020_v17 = vsel %vm2978_vm9, %v2234_v50, %v1016_v59  ;;  %v1024_v2 = vor.u32 1.1754944e-38, %v1023_v9  ;;  %vm994_vm13 = vmor %vm992_vm11, %vm993_vm10 }
 0x270   :  { %v2240_v44 = vpop.eup %2239  ;;  %v1044_v43 = vmul.f32 %v1042_v53, %v985_v10  ;;  %v989_v57 = vsub.f32 1.0, %v988_v14  ;;  %v1043_v10 = vadd.f32 %v2751_v18, %v959_v15  ;;  %v1038_v9 = vand.u32 2147483648, %v2971_v45 }
 0x271   :  { %v1028_v62 = vmul.f32 %v2240_v44, %v2971_v45  ;;  %vm997_vm14 = vcmp.eq.f32.partialorder %v996_v24, 8.507059e+37  ;;  %vm1033_vm15 = vweird.f32 %v2240_v44  ;;  %v1036_v0 = vand.u32 2147483647, %v2971_v45 }
 0x272   :  { %v990_v54 = vmul.f32 %v2238_v61, %v989_v57  ;;  %v1046_v63 = vadd.f32 %v1044_v43, %v362_v35  ;;  %v1025_v57 = vsel %vm1022_vm12, %v1024_v2, %v1020_v17  ;;  %v364_v35 = vadd.f32 %v2935_v19, %v2754_v25  ;;  %vm1034_vm1 = vmor %vm1032_vm0, %vm1033_vm15 }
 0x273   :  { %v1029_v7 = vsub.f32 1.0, %v1028_v62  ;;  %v1050_v50 = vsub.f32 1.0, %v1025_v57  ;;  %v1039_v47 = vor.u32 1.1754944e-38, %v1038_v9  ;;  %vm1037_vm2 = vcmp.eq.f32.partialorder %v1036_v0, 8.507059e+37 }
 0x274   :  { %v991_v53 = vadd.f32 %v2238_v61, %v990_v54  ;;  %2241 = vtanh.f32 %v1046_v63 }
 0x275   :  { %v1030_v14 = vmul.f32 %v2240_v44, %v1029_v7 }
 0x276   :  { %v995_v33 = vsel %vm994_vm13, %v2238_v61, %v991_v53 }
 0x277   :  { %v1000_v39 = vsel %vm997_vm14, %v999_v49, %v995_v33  ;;  %v1031_v43 = vadd.f32 %v2240_v44, %v1030_v14  ;;  %v1054_v33 = vmul.f32 %v1025_v57, %v2909_v30  ;;  %v3393_v49 = vld [vmem:[#allocation18_spill] sm:$0xff]  ;;  %v3394_v57 = vld [vmem:[#allocation16_spill] sm:$0xff] }
 0x278   :  { %v1045_v59 = vmul.f32 %v1043_v10, %v1000_v39  ;;  %v318_v14 = vadd.f32 %v3393_v49, %v2724_v23 }
 0x279   :  { %v1035_v61 = vsel %vm1034_vm1, %v2240_v44, %v1031_v43  ;;  %v269_v44 = vadd.f32 %v2819_v41, %v2716_v1  ;;  %v271_v43 = vadd.f32 %v3394_v57, %v2716_v1  ;;  %v3395_v41 = vld [vmem:[#allocation20_spill] sm:$0xff] }
 0x27a   :  { %v2242_v34 = vpop.eup %2241  ;;  %v1047_v56 = vadd.f32 %v1045_v59, %v364_v35  ;;  %v1040_v19 = vsel %vm1037_vm2, %v1039_v47, %v1035_v61  ;;  %v320_v61 = vadd.f32 %v3395_v41, %v2724_v23  ;;  %v367_v41 = vadd.f32 %v2943_v12, %v2754_v25 }
 0x27b   :  { %v1052_v62 = vmul.f32 %v2242_v34, %v1050_v50  ;;  %v1051_v39 = vsub.f32 1.0, %v1040_v19  ;;  %v1055_v15 = vmul.f32 %v1040_v19, %v2911_v37 }
 0x27c   :  { %2243 = vtanh.f32 %v1047_v56 }
 0x27d   :  { %v2991_v54 = vadd.f32 %v1054_v33, %v1052_v62 }
 0x282   :  { %v2244_v24 = vpop.eup %2243 }
 0x283   :  { %v1053_v63 = vmul.f32 %v2244_v24, %v1051_v39 }
 0x285   :  { %v2994_v45 = vadd.f32 %v1055_v15, %v1053_v63 }
 0x287   :  { %v1072_v7 = vpack.c.bf16 %v2994_v45, %v2991_v54 }
 0x289   :  { %1081 = vmatmul.bf16.vlgmr.msra.gmra.mxu1 %v1072_v7  ;;  %1095 = vmatmul.bf16.vlgmr.msra.gmra.mxu2 %v1072_v7 }
 0x28a   :  { %1109 = vmatmul.bf16.vlgmr.msrb.gmra.mxu3 %v1072_v7  ;;  %1407 = vmatpush.bf16.msra.mxu1 %v2571_v4 }
 0x28b   :  { %1532 = vmatpush.bf16.msra.mxu2 %v2478_v3  ;;  %1546 = vmatpush.bf16.msrb.mxu3 %v2513_v32 }
 0x28e   :  { %1408 = vmatpush.bf16.msra.mxu1 %v2579_v11 }
 0x28f   :  { %1533 = vmatpush.bf16.msra.mxu2 %v2481_v5  ;;  %1547 = vmatpush.bf16.msrb.mxu3 %v2527_v42 }
 0x292   :  { %1409 = vmatpush.bf16.msra.mxu1 %v2594_v22 }
 0x293   :  { %1534 = vmatpush.bf16.msra.mxu2 %v2490_v13  ;;  %1548 = vmatpush.bf16.msrb.mxu3 %v2542_v51 }
 0x296   :  { %1410 = vmatpush.bf16.msra.mxu1 %v2602_v31 }
 0x297   :  { %1535 = vmatpush.bf16.msra.mxu2 %v2502_v21  ;;  %1549 = vmatpush.bf16.msrb.mxu3 %v2558_v60 }
 0x29a   :  { %1411 = vmatpush.bf16.msra.mxu1 %v2615_v40 }
 0x29b   :  { %1536 = vmatpush.bf16.msra.mxu2 %v2511_v29  ;;  %1550 = vmatpush.bf16.msrb.mxu3 %v2575_v8 }
 0x29e   :  { %1412 = vmatpush.bf16.msra.mxu1 %v2627_v48 }
 0x29f   :  { %1537 = vmatpush.bf16.msra.mxu2 %v2518_v36  ;;  %1551 = vmatpush.bf16.msrb.mxu3 %v2585_v16 }
 0x2a2   :  { %1413 = vmatpush.bf16.msra.mxu1 %v2635_v52 }
 0x2a3   :  { %1538 = vmatpush.bf16.msra.mxu2 %v2533_v46  ;;  %1552 = vmatpush.bf16.msrb.mxu3 %v2598_v26 }
 0x2a6   :  { %1414 = vmatpush.bf16.msra.mxu1 %v2641_v58 }
 0x2a7   :  { %1539 = vmatpush.bf16.msra.mxu2 %v2545_v55  ;;  %1553 = vmatpush.bf16.msrb.mxu3 %v2612_v38 }
 0x306   :  { %v1082_v17 = vpop.f32.mrf.mxu1 }
 0x307   :  { %v1115_v2 = vadd.f32 %v1082_v17, %v269_v44 }
 0x309   :  { %v2109_v53 = vmul.f32 -1.442695, %v1115_v2 }
 0x30b   :  { %2245 = vpow2.f32 %v2109_v53 }
 0x30c   :  { %v1096_v10 = vpop.f32.mrf.mxu2 }
 0x30d   :  { %v1155_v35 = vadd.f32 %v1096_v10, %v318_v14  ;;  %v1110_v53 = vpop.f32.mrf.mxu3 }
 0x30e   :  { %v1084_v59 = vpop.f32.mrf.mxu1 }
 0x30f   :  { %v2111_v9 = vmul.f32 -1.442695, %v1155_v35  ;;  %v1116_v0 = vadd.f32 %v1084_v59, %v271_v43 }
 0x311   :  { %v2246_v50 = vpop.eup %2245  ;;  %2247 = vpow2.f32 %v2111_v9  ;;  %v2110_v34 = vmul.f32 -1.442695, %v1116_v0 }
 0x312   :  { %v1123_v56 = vadd.f32 1.0, %v2246_v50 }
 0x313   :  { %2249 = vpow2.f32 %v2110_v34  ;;  %v1195_v34 = vadd.f32 %v2751_v18, %v1110_v53 }
 0x314   :  { %2251 = vrcp.f32 %v1123_v56  ;;  %v1098_v62 = vpop.f32.mrf.mxu2  ;;  %v1136_v17 = vand.u32 2147483648, %v1123_v56  ;;  %v1134_v14 = vand.u32 2147483647, %v1123_v56  ;;  %vm1130_vm4 = vweird.f32 %v1123_v56 }
 0x315   :  { %v1156_v33 = vadd.f32 %v1098_v62, %v320_v61 }
 0x316   :  { %v1137_v59 = vor.u32 1.1754944e-38, %v1136_v17  ;;  %vm1135_vm6 = vcmp.eq.f32.partialorder %v1134_v14, 8.507059e+37 }
 0x317   :  { %v2248_v47 = vpop.eup %2247  ;;  %v2112_v19 = vmul.f32 -1.442695, %v1156_v33 }
 0x318   :  { %v1163_v39 = vadd.f32 1.0, %v2248_v47 }
 0x319   :  { %v2250_v24 = vpop.eup %2249  ;;  %2253 = vpow2.f32 %v2112_v19 }
 0x31a   :  { %v2252_v63 = vpop.eup %2251  ;;  %2255 = vrcp.f32 %v1163_v39  ;;  %v1124_v7 = vadd.f32 1.0, %v2250_v24  ;;  %v1176_v47 = vand.u32 2147483648, %v1163_v39  ;;  %vm1170_vm8 = vweird.f32 %v1163_v39 }
 0x31b   :  { %v1126_v15 = vmul.f32 %v2252_v63, %v1123_v56  ;;  %vm1131_vm3 = vweird.f32 %v2252_v63  ;;  %v1174_v56 = vand.u32 2147483647, %v1163_v39 }
 0x31c   :  { %2257 = vrcp.f32 %v1124_v7  ;;  %vm1132_vm5 = vmor %vm1130_vm4, %vm1131_vm3  ;;  %v1151_v17 = vand.u32 2147483648, %v1124_v7  ;;  %v1149_v53 = vand.u32 2147483647, %v1124_v7  ;;  %vm1145_vm12 = vweird.f32 %v1124_v7 }
 0x31d   :  { %v1127_v44 = vsub.f32 1.0, %v1126_v15  ;;  %vm1175_vm11 = vcmp.eq.f32.partialorder %v1174_v56, 8.507059e+37 }
 0x31e   :  { %vm1150_vm14 = vcmp.eq.f32.partialorder %v1149_v53, 8.507059e+37 }
 0x31f   :  { %v2254_v2 = vpop.eup %2253  ;;  %v1128_v49 = vmul.f32 %v2252_v63, %v1127_v44 }
 0x320   :  { %v2256_v10 = vpop.eup %2255  ;;  %v3030_v57 = vadd.f32 1.0, %v2254_v2 }
 0x321   :  { %v1166_v43 = vmul.f32 %v2256_v10, %v1163_v39  ;;  %v1129_v35 = vadd.f32 %v2252_v63, %v1128_v49  ;;  %vm1171_vm7 = vweird.f32 %v2256_v10  ;;  %v1177_v49 = vor.u32 1.1754944e-38, %v1176_v47 }
 0x322   :  { %2259 = vrcp.f32 %v3030_v57  ;;  %v2258_v9 = vpop.eup %2257  ;;  %vm1172_vm9 = vmor %vm1170_vm8, %vm1171_vm7  ;;  %v1152_v39 = vor.u32 1.1754944e-38, %v1151_v17  ;;  %vm1185_vm0 = vweird.f32 %v3030_v57  ;;  %v1189_v56 = vand.u32 2147483647, %v3030_v57 }
 0x323   :  { %v1167_v0 = vsub.f32 1.0, %v1166_v43  ;;  %v1133_v50 = vsel %vm1132_vm5, %v2252_v63, %v1129_v35  ;;  %v1141_v62 = vmul.f32 %v2258_v9, %v1124_v7  ;;  %vm1146_vm10 = vweird.f32 %v2258_v9  ;;  %v1112_v43 = vpop.f32.mrf.mxu3 }
 0x324   :  { %v1138_v61 = vsel %vm1135_vm6, %v1137_v59, %v1133_v50  ;;  %vm1147_vm13 = vmor %vm1145_vm12, %vm1146_vm10  ;;  %vm1190_vm2 = vcmp.eq.f32.partialorder %v1189_v56, 8.507059e+37 }
 0x325   :  { %v1168_v33 = vmul.f32 %v2256_v10, %v1167_v0  ;;  %v1197_v19 = vmul.f32 %v1195_v34, %v1138_v61  ;;  %v1142_v24 = vsub.f32 1.0, %v1141_v62  ;;  %v1196_v34 = vadd.f32 %v2751_v18, %v1112_v43 }
 0x327   :  { %v1169_v15 = vadd.f32 %v2256_v10, %v1168_v33  ;;  %v1199_v44 = vadd.f32 %v1197_v19, %v367_v41  ;;  %v1143_v63 = vmul.f32 %v2258_v9, %v1142_v24  ;;  %v1191_v33 = vand.u32 2147483648, %v3030_v57 }
 0x328   :  { %v2260_v2 = vpop.eup %2259 }
 0x329   :  { %v1173_v14 = vsel %vm1172_vm9, %v2256_v10, %v1169_v15  ;;  %2261 = vtanh.f32 %v1199_v44  ;;  %v1181_v12 = vmul.f32 %v2260_v2, %v3030_v57  ;;  %v1144_v35 = vadd.f32 %v2258_v9, %v1143_v63 }
 0x32a   :  { %v1178_v59 = vsel %vm1175_vm11, %v1177_v49, %v1173_v14  ;;  %vm1186_vm15 = vweird.f32 %v2260_v2  ;;  %v369_v10 = vadd.f32 %v2945_v27, %v2754_v25  ;;  %v1192_v44 = vor.u32 1.1754944e-38, %v1191_v33 }
 0x32b   :  { %v1182_v0 = vsub.f32 1.0, %v1181_v12  ;;  %v1148_v50 = vsel %vm1147_vm13, %v2258_v9, %v1144_v35  ;;  %v1203_v62 = vsub.f32 1.0, %v1178_v59  ;;  %vm1187_vm1 = vmor %vm1185_vm0, %vm1186_vm15  ;;  %v1207_v18 = vmul.f32 %v1178_v59, %v2991_v54 }
 0x32c   :  { %v1153_v61 = vsel %vm1150_vm14, %v1152_v39, %v1148_v50 }
 0x32d   :  { %v1183_v41 = vmul.f32 %v2260_v2, %v1182_v0  ;;  %v1198_v47 = vmul.f32 %v1196_v34, %v1153_v61 }
 0x32f   :  { %v2262_v19 = vpop.eup %2261  ;;  %v1184_v7 = vadd.f32 %v2260_v2, %v1183_v41  ;;  %v1200_v24 = vadd.f32 %v1198_v47, %v369_v10 }
 0x330   :  { %v1205_v9 = vmul.f32 %v2262_v19, %v1203_v62 }
 0x331   :  { %v1188_v15 = vsel %vm1187_vm1, %v2260_v2, %v1184_v7  ;;  %2263 = vtanh.f32 %v1200_v24 }
 0x332   :  { %v3044_v17 = vadd.f32 %v1207_v18, %v1205_v9  ;;  %v1193_v27 = vsel %vm1190_vm2, %v1192_v44, %v1188_v15 }
 0x333   :  { %v1204_v63 = vsub.f32 1.0, %v1193_v27  ;;  %v1208_v14 = vmul.f32 %v1193_v27, %v2994_v45 }
 0x337   :  { %v2264_v53 = vpop.eup %2263 }
 0x338   :  { %v1206_v49 = vmul.f32 %v2264_v53, %v1204_v63 }
 0x33a   :  { %v3047_v12 = vadd.f32 %v1208_v14, %v1206_v49 }
 0x33c   :  { %v1225_v57 = vpack.c.bf16 %v3047_v12, %v3044_v17 }
 0x33e   :  { %1234 = vmatmul.bf16.vlgmr.msrb.gmra.mxu0 %v1225_v57  ;;  %1248 = vmatmul.bf16.vlgmr.msrb.gmra.mxu1 %v1225_v57 }
 0x33f   :  { %1262 = vmatmul.bf16.vlgmr.msrb.gmra.mxu2 %v1225_v57  ;;  %1560 = vmatpush.bf16.msrb.mxu0 %v2571_v4  ;;  %v3089_v57 = vld [vmem:[%s3354_s6] ss:$0 sm:$0xff] }
 0x340   :  { %1685 = vmatpush.bf16.msrb.mxu1 %v2478_v3  ;;  %1699 = vmatpush.bf16.msrb.mxu2 %v2513_v32  ;;  %v3396_v3 = vld [vmem:[#allocation17_spill] sm:$0xff] }
 0x343   :  { %1561 = vmatpush.bf16.msrb.mxu0 %v2579_v11 }
 0x344   :  { %1686 = vmatpush.bf16.msrb.mxu1 %v2481_v5  ;;  %1700 = vmatpush.bf16.msrb.mxu2 %v2527_v42  ;;  %v274_v5 = vadd.f32 %v3396_v3, %v2716_v1 }
 0x347   :  { %1562 = vmatpush.bf16.msrb.mxu0 %v2594_v22 }
 0x348   :  { %1687 = vmatpush.bf16.msrb.mxu1 %v2490_v13  ;;  %1701 = vmatpush.bf16.msrb.mxu2 %v2542_v51  ;;  %v3397_v13 = vld [vmem:[#allocation22_spill] sm:$0xff] }
 0x34b   :  { %1563 = vmatpush.bf16.msrb.mxu0 %v2602_v31 }
 0x34c   :  { %1688 = vmatpush.bf16.msrb.mxu1 %v2502_v21  ;;  %1702 = vmatpush.bf16.msrb.mxu2 %v2558_v60  ;;  %v323_v21 = vadd.f32 %v3397_v13, %v2724_v23  ;;  %v3398_v60 = vld [vmem:[#allocation19_spill] sm:$0xff] }
 0x34f   :  { %1564 = vmatpush.bf16.msrb.mxu0 %v2615_v40 }
 0x350   :  { %1689 = vmatpush.bf16.msrb.mxu1 %v2511_v29  ;;  %1703 = vmatpush.bf16.msrb.mxu2 %v2575_v8  ;;  %v276_v8 = vadd.f32 %v3398_v60, %v2716_v1 }
 0x353   :  { %1565 = vmatpush.bf16.msrb.mxu0 %v2627_v48 }
 0x354   :  { %1690 = vmatpush.bf16.msrb.mxu1 %v2518_v36  ;;  %1704 = vmatpush.bf16.msrb.mxu2 %v2585_v16 }
 0x357   :  { %1566 = vmatpush.bf16.msrb.mxu0 %v2635_v52 }
 0x358   :  { %1691 = vmatpush.bf16.msrb.mxu1 %v2533_v46  ;;  %1705 = vmatpush.bf16.msrb.mxu2 %v2598_v26 }
 0x35b   :  { %1567 = vmatpush.bf16.msrb.mxu0 %v2641_v58 }
 0x35c   :  { %1692 = vmatpush.bf16.msrb.mxu1 %v2545_v55  ;;  %1706 = vmatpush.bf16.msrb.mxu2 %v2612_v38  ;;  %v3399_v55 = vld [vmem:[#allocation24_spill] sm:$0xff] }
 0x35d   :  { %v325_v16 = vadd.f32 %v3399_v55, %v2724_v23 }
 0x3bb   :  { %v1235_v29 = vpop.f32.mrf.mxu0  ;;  %v1249_v32 = vpop.f32.mrf.mxu1 }
 0x3bc   :  { %v1268_v36 = vadd.f32 %v1235_v29, %v274_v5  ;;  %v1308_v42 = vadd.f32 %v1249_v32, %v323_v21  ;;  %v372_v32 = vadd.f32 %v2947_v20, %v2754_v25 }
 0x3be   :  { %v2114_v51 = vmul.f32 -1.442695, %v1268_v36  ;;  %v2116_v46 = vmul.f32 -1.442695, %v1308_v42 }
 0x3c0   :  { %2265 = vpow2.f32 %v2114_v51 }
 0x3c1   :  { %2267 = vpow2.f32 %v2116_v46 }
 0x3c2   :  { %v1263_v24 = vpop.f32.mrf.mxu2 }
 0x3c3   :  { %v1237_v26 = vpop.f32.mrf.mxu0  ;;  %v1251_v38 = vpop.f32.mrf.mxu1  ;;  %v1348_v3 = vadd.f32 %v3089_v57, %v1263_v24 }
 0x3c4   :  { %v1269_v2 = vadd.f32 %v1237_v26, %v276_v8  ;;  %v1309_v43 = vadd.f32 %v1251_v38, %v325_v16 }
 0x3c6   :  { %v2266_v35 = vpop.eup %2265  ;;  %v2115_v59 = vmul.f32 -1.442695, %v1269_v2  ;;  %v2117_v50 = vmul.f32 -1.442695, %v1309_v43 }
 0x3c7   :  { %v2268_v0 = vpop.eup %2267  ;;  %v1276_v39 = vadd.f32 1.0, %v2266_v35 }
 0x3c8   :  { %v1316_v34 = vadd.f32 1.0, %v2268_v0  ;;  %2269 = vpow2.f32 %v2115_v59 }
 0x3c9   :  { %2271 = vrcp.f32 %v1276_v39  ;;  %v1289_v18 = vand.u32 2147483648, %v1276_v39  ;;  %v1287_v44 = vand.u32 2147483647, %v1276_v39  ;;  %vm1283_vm4 = vweird.f32 %v1276_v39 }
 0x3ca   :  { %2273 = vrcp.f32 %v1316_v34  ;;  %v1329_v36 = vand.u32 2147483648, %v1316_v34  ;;  %vm1323_vm8 = vweird.f32 %v1316_v34  ;;  %v1327_v46 = vand.u32 2147483647, %v1316_v34  ;;  %v1265_v43 = vpop.f32.mrf.mxu2 }
 0x3cb   :  { %2275 = vpow2.f32 %v2117_v50  ;;  %v1290_v49 = vor.u32 1.1754944e-38, %v1289_v18  ;;  %vm1288_vm6 = vcmp.eq.f32.partialorder %v1287_v44, 8.507059e+37 }
 0x3cc   :  { %v1330_v35 = vor.u32 1.1754944e-38, %v1329_v36  ;;  %vm1328_vm12 = vcmp.eq.f32.partialorder %v1327_v46, 8.507059e+37 }
 0x3ce   :  { %v2270_v41 = vpop.eup %2269 }
 0x3cf   :  { %v2272_v61 = vpop.eup %2271  ;;  %v1277_v10 = vadd.f32 1.0, %v2270_v41  ;;  %v1349_v41 = vadd.f32 %v3089_v57, %v1265_v43 }
 0x3d0   :  { %v2274_v62 = vpop.eup %2273  ;;  %v1279_v33 = vmul.f32 %v2272_v61, %v1276_v39  ;;  %vm1284_vm3 = vweird.f32 %v2272_v61 }
 0x3d1   :  { %v2276_v47 = vpop.eup %2275  ;;  %v1319_v19 = vmul.f32 %v2274_v62, %v1316_v34  ;;  %2277 = vrcp.f32 %v1277_v10  ;;  %vm1285_vm5 = vmor %vm1283_vm4, %vm1284_vm3  ;;  %vm1324_vm7 = vweird.f32 %v2274_v62  ;;  %v1304_v8 = vand.u32 2147483648, %v1277_v10 }
 0x3d2   :  { %v1280_v7 = vsub.f32 1.0, %v1279_v33  ;;  %v3083_v56 = vadd.f32 1.0, %v2276_v47  ;;  %vm3095_vm9 = vmor %vm1323_vm8, %vm1324_vm7  ;;  %v1302_v38 = vand.u32 2147483647, %v1277_v10  ;;  %vm1298_vm11 = vweird.f32 %v1277_v10 }
 0x3d3   :  { %v1320_v9 = vsub.f32 1.0, %v1319_v19  ;;  %v1305_v39 = vor.u32 1.1754944e-38, %v1304_v8  ;;  %v3405_v8 = vld [vmem:[#allocation23_spill] sm:$0xff] }
 0x3d4   :  { %v1281_v15 = vmul.f32 %v2272_v61, %v1280_v7  ;;  %2279 = vrcp.f32 %v3083_v56  ;;  %vm1303_vm14 = vcmp.eq.f32.partialorder %v1302_v38, 8.507059e+37  ;;  %v1344_v47 = vand.u32 2147483648, %v3083_v56 }
 0x3d5   :  { %v1321_v27 = vmul.f32 %v2274_v62, %v1320_v9  ;;  %vm1338_vm0 = vweird.f32 %v3083_v56  ;;  %v281_v55 = vadd.f32 %v3405_v8, %v2716_v1 }
 0x3d6   :  { %v1282_v63 = vadd.f32 %v2272_v61, %v1281_v15 }
 0x3d7   :  { %v2278_v53 = vpop.eup %2277  ;;  %v1322_v13 = vadd.f32 %v2274_v62, %v1321_v27  ;;  %v1345_v27 = vor.u32 1.1754944e-38, %v1344_v47 }
 0x3d8   :  { %v1286_v14 = vsel %vm1285_vm5, %v2272_v61, %v1282_v63  ;;  %v1294_v5 = vmul.f32 %v2278_v53, %v1277_v10  ;;  %vm1299_vm10 = vweird.f32 %v2278_v53  ;;  %v1342_v10 = vand.u32 2147483647, %v3083_v56 }
 0x3d9   :  { %v1291_v21 = vsel %vm1288_vm6, %v1290_v49, %v1286_v14  ;;  %v1326_v2 = vsel %vm3095_vm9, %v2274_v62, %v1322_v13  ;;  %vm1300_vm13 = vmor %vm1298_vm11, %vm1299_vm10  ;;  %v374_v62 = vadd.f32 %v2949_v28, %v2754_v25  ;;  %v3402_v13 = vld [vmem:[#allocation26_spill] sm:$0xff] }
 0x3da   :  { %v2280_v29 = vpop.eup %2279  ;;  %v1350_v42 = vmul.f32 %v1348_v3, %v1291_v21  ;;  %v1295_v51 = vsub.f32 1.0, %v1294_v5  ;;  %v1331_v50 = vsel %vm1328_vm12, %v1330_v35, %v1326_v2  ;;  %vm1343_vm2 = vcmp.eq.f32.partialorder %v1342_v10, 8.507059e+37 }
 0x3db   :  { %v1334_v60 = vmul.f32 %v2280_v29, %v3083_v56  ;;  %vm1339_vm15 = vweird.f32 %v2280_v29  ;;  %v1356_v7 = vsub.f32 1.0, %v1331_v50  ;;  %v1360_v44 = vmul.f32 %v1331_v50, %v3044_v17 }
 0x3dc   :  { %v1352_v16 = vadd.f32 %v1350_v42, %v372_v32  ;;  %v1296_v26 = vmul.f32 %v2278_v53, %v1295_v51  ;;  %vm1340_vm1 = vmor %vm1338_vm0, %vm1339_vm15  ;;  %v328_v21 = vadd.f32 %v3402_v13, %v2724_v23 }
 0x3dd   :  { %v1335_v20 = vsub.f32 1.0, %v1334_v60 }
 0x3de   :  { %2281 = vtanh.f32 %v1352_v16  ;;  %v1297_v59 = vadd.f32 %v2278_v53, %v1296_v26 }
 0x3df   :  { %v1336_v0 = vmul.f32 %v2280_v29, %v1335_v20 }
 0x3e0   :  { %v1301_v34 = vsel %vm1300_vm13, %v2278_v53, %v1297_v59 }
 0x3e1   :  { %v1337_v61 = vadd.f32 %v2280_v29, %v1336_v0  ;;  %v1306_v33 = vsel %vm1303_vm14, %v1305_v39, %v1301_v34 }
 0x3e2   :  { %v1351_v19 = vmul.f32 %v1349_v41, %v1306_v33 }
 0x3e3   :  { %v1341_v15 = vsel %vm1340_vm1, %v2280_v29, %v1337_v61 }
 0x3e4   :  { %v2282_v9 = vpop.eup %2281  ;;  %v1353_v24 = vadd.f32 %v1351_v19, %v374_v62  ;;  %v1346_v28 = vsel %vm1343_vm2, %v1345_v27, %v1341_v15 }
 0x3e5   :  { %v1358_v18 = vmul.f32 %v2282_v9, %v1356_v7  ;;  %v1357_v53 = vsub.f32 1.0, %v1346_v28  ;;  %v1361_v3 = vmul.f32 %v1346_v28, %v3047_v12 }
 0x3e6   :  { %2283 = vtanh.f32 %v1353_v24 }
 0x3e7   :  { %v3108_v63 = vadd.f32 %v1360_v44, %v1358_v18 }
 0x3ec   :  { %v2284_v49 = vpop.eup %2283 }
 0x3ed   :  { %v1359_v14 = vmul.f32 %v2284_v49, %v1357_v53 }
 0x3ef   :  { %v3111_v5 = vadd.f32 %v1361_v3, %v1359_v14 }
 0x3f1   :  { %v1378_v56 = vpack.c.bf16 %v3111_v5, %v3108_v63 }
 0x3f3   :  { %1387 = vmatmul.bf16.vlgmr.msra.gmra.mxu3 %v1378_v56  ;;  %1401 = vmatmul.bf16.vlgmr.msra.gmra.mxu0 %v1378_v56 }
 0x3f4   :  { %1415 = vmatmul.bf16.vlgmr.msra.gmra.mxu1 %v1378_v56  ;;  %1713 = vmatpush.bf16.msra.mxu3 %v2571_v4  ;;  %v377_v56 = vadd.f32 %v2951_v6, %v2754_v25 }
 0x3f8   :  { %1714 = vmatpush.bf16.msra.mxu3 %v2579_v11  ;;  %v3403_v11 = vld [vmem:[#allocation21_spill] sm:$0xff] }
 0x3f9   :  { %v279_v36 = vadd.f32 %v3403_v11, %v2716_v1 }
 0x3fc   :  { %1715 = vmatpush.bf16.msra.mxu3 %v2594_v22 }
 0x400   :  { %1716 = vmatpush.bf16.msra.mxu3 %v2602_v31  ;;  %v3404_v31 = vld [vmem:[#allocation28_spill] sm:$0xff] }
 0x404   :  { %1717 = vmatpush.bf16.msra.mxu3 %v2615_v40  ;;  %v330_v40 = vadd.f32 %v3404_v31, %v2724_v23 }
 0x408   :  { %1718 = vmatpush.bf16.msra.mxu3 %v2627_v48 }
 0x40c   :  { %1719 = vmatpush.bf16.msra.mxu3 %v2635_v52 }
 0x410   :  { %1720 = vmatpush.bf16.msra.mxu3 %v2641_v58 }
 0x470   :  { %v1402_v29 = vpop.f32.mrf.mxu0 }
 0x471   :  { %v1461_v32 = vadd.f32 %v1402_v29, %v328_v21  ;;  %v1416_v47 = vpop.f32.mrf.mxu1 }
 0x472   :  { %v1501_v27 = vadd.f32 %v3089_v57, %v1416_v47 }
 0x473   :  { %v2121_v4 = vmul.f32 -1.442695, %v1461_v32 }
 0x475   :  { %2285 = vpow2.f32 %v2121_v4 }
 0x476   :  { %v1388_v22 = vpop.f32.mrf.mxu3 }
 0x477   :  { %v1421_v42 = vadd.f32 %v1388_v22, %v279_v36 }
 0x478   :  { %v1404_v48 = vpop.f32.mrf.mxu0 }
 0x479   :  { %v2119_v51 = vmul.f32 -1.442695, %v1421_v42  ;;  %v1462_v52 = vadd.f32 %v1404_v48, %v330_v40  ;;  %v1418_v6 = vpop.f32.mrf.mxu1 }
 0x47b   :  { %v2286_v46 = vpop.eup %2285  ;;  %2287 = vpow2.f32 %v2119_v51  ;;  %v2122_v58 = vmul.f32 -1.442695, %v1462_v52 }
 0x47c   :  { %v3129_v60 = vadd.f32 1.0, %v2286_v46  ;;  %v1502_v46 = vadd.f32 %v3089_v57, %v1418_v6 }
 0x47d   :  { %2289 = vpow2.f32 %v2122_v58 }
 0x47e   :  { %v1390_v16 = vpop.f32.mrf.mxu3  ;;  %2291 = vrcp.f32 %v3129_v60  ;;  %v1482_v13 = vand.u32 2147483648, %v3129_v60  ;;  %vm1476_vm8 = vweird.f32 %v3129_v60  ;;  %v1480_v32 = vand.u32 2147483647, %v3129_v60 }
 0x47f   :  { %v1422_v26 = vadd.f32 %v1390_v16, %v281_v55  ;;  %v3408_v16 = vld [vmem:[#allocation35_spill] sm:$0xff] }
 0x480   :  { %v1483_v48 = vor.u32 1.1754944e-38, %v1482_v13  ;;  %vm1481_vm12 = vcmp.eq.f32.partialorder %v1480_v32, 8.507059e+37  ;;  %v3412_v13 = vld [vmem:[#allocation32_spill] sm:$0xff] }
 0x481   :  { %v2288_v38 = vpop.eup %2287  ;;  %v2120_v2 = vmul.f32 -1.442695, %v1422_v26  ;;  %v379_v26 = vadd.f32 %v3408_v16, %v2754_v25 }
 0x482   :  { %v1429_v20 = vadd.f32 1.0, %v2288_v38 }
 0x483   :  { %v2290_v43 = vpop.eup %2289  ;;  %2293 = vpow2.f32 %v2120_v2 }
 0x484   :  { %2295 = vrcp.f32 %v1429_v20  ;;  %v2292_v35 = vpop.eup %2291  ;;  %v3134_v59 = vadd.f32 1.0, %v2290_v43  ;;  %v1442_v19 = vand.u32 2147483648, %v1429_v20  ;;  %v1440_v10 = vand.u32 2147483647, %v1429_v20 }
 0x485   :  { %v1472_v0 = vmul.f32 %v2292_v35, %v3129_v60  ;;  %vm1436_vm4 = vweird.f32 %v1429_v20  ;;  %vm1477_vm7 = vweird.f32 %v2292_v35 }
 0x486   :  { %2297 = vrcp.f32 %v3134_v59  ;;  %v1443_v44 = vor.u32 1.1754944e-38, %v1442_v19  ;;  %vm1441_vm6 = vcmp.eq.f32.partialorder %v1440_v10, 8.507059e+37  ;;  %vm3148_vm9 = vmor %vm1476_vm8, %vm1477_vm7  ;;  %v1497_v38 = vand.u32 2147483648, %v3134_v59 }
 0x487   :  { %v1473_v61 = vsub.f32 1.0, %v1472_v0  ;;  %vm1491_vm0 = vweird.f32 %v3134_v59 }
 0x489   :  { %v2294_v39 = vpop.eup %2293  ;;  %v1474_v9 = vmul.f32 %v2292_v35, %v1473_v61 }
 0x48a   :  { %v2296_v50 = vpop.eup %2295  ;;  %v1430_v34 = vadd.f32 1.0, %v2294_v39 }
 0x48b   :  { %v1432_v41 = vmul.f32 %v2296_v50, %v1429_v20  ;;  %vm1437_vm3 = vweird.f32 %v2296_v50  ;;  %v1475_v49 = vadd.f32 %v2292_v35, %v1474_v9  ;;  %v1495_v20 = vand.u32 2147483647, %v3134_v59 }
 0x48c   :  { %2299 = vrcp.f32 %v1430_v34  ;;  %v3138_v33 = vpop.eup %2297  ;;  %vm1438_vm5 = vmor %vm1436_vm4, %vm1437_vm3  ;;  %v1457_v4 = vand.u32 2147483648, %v1430_v34  ;;  %v1455_v22 = vand.u32 2147483647, %v1430_v34  ;;  %vm1451_vm11 = vweird.f32 %v1430_v34 }
 0x48d   :  { %v1433_v62 = vsub.f32 1.0, %v1432_v41  ;;  %v1487_v24 = vmul.f32 %v3138_v33, %v3134_v59  ;;  %v1479_v42 = vsel %vm3148_vm9, %v2292_v35, %v1475_v49  ;;  %vm1492_vm15 = vweird.f32 %v3138_v33 }
 0x48e   :  { %v1458_v52 = vor.u32 1.1754944e-38, %v1457_v4  ;;  %vm1456_vm14 = vcmp.eq.f32.partialorder %v1455_v22, 8.507059e+37  ;;  %v1484_v60 = vsel %vm1481_vm12, %v1483_v48, %v1479_v42  ;;  %vm1493_vm1 = vmor %vm1491_vm0, %vm1492_vm15  ;;  %v1498_v41 = vor.u32 1.1754944e-38, %v1497_v38 }
 0x48f   :  { %v1434_v7 = vmul.f32 %v2296_v50, %v1433_v62  ;;  %v1488_v3 = vsub.f32 1.0, %v1487_v24  ;;  %v1509_v43 = vsub.f32 1.0, %v1484_v60  ;;  %vm1496_vm2 = vcmp.eq.f32.partialorder %v1495_v20, 8.507059e+37 }
 0x491   :  { %v1435_v18 = vadd.f32 %v2296_v50, %v1434_v7  ;;  %v1489_v40 = vmul.f32 %v3138_v33, %v1488_v3  ;;  %v3411_v3 = vld [vmem:[#allocation27_spill] sm:$0xff] }
 0x492   :  { %v2300_v15 = vpop.eup %2299 }
 0x493   :  { %v1439_v28 = vsel %vm1438_vm5, %v2296_v50, %v1435_v18  ;;  %v1447_v53 = vmul.f32 %v2300_v15, %v1430_v34  ;;  %vm1452_vm10 = vweird.f32 %v2300_v15  ;;  %v1490_v8 = vadd.f32 %v3138_v33, %v1489_v40  ;;  %v3410_v18 = vld [vmem:[#allocation30_spill] sm:$0xff] }
 0x494   :  { %v1444_v14 = vsel %vm1441_vm6, %v1443_v44, %v1439_v28  ;;  %vm1453_vm13 = vmor %vm1451_vm11, %vm1452_vm10  ;;  %v1513_v34 = vmul.f32 %v1484_v60, %v3108_v63 }
 0x495   :  { %v1503_v21 = vmul.f32 %v1501_v27, %v1444_v14  ;;  %v1448_v29 = vsub.f32 1.0, %v1447_v53  ;;  %v1494_v39 = vsel %vm1493_vm1, %v3138_v33, %v1490_v8  ;;  %v3409_v33 = vld [vmem:[#allocation25_spill] sm:$0xff] }
 0x496   :  { %v1499_v62 = vsel %vm1496_vm2, %v1498_v41, %v1494_v39  ;;  %v284_v24 = vadd.f32 %v3409_v33, %v2716_v1 }
 0x497   :  { %v1449_v36 = vmul.f32 %v2300_v15, %v1448_v29  ;;  %v1505_v31 = vadd.f32 %v1503_v21, %v377_v56  ;;  %v1510_v47 = vsub.f32 1.0, %v1499_v62  ;;  %v1514_v59 = vmul.f32 %v1499_v62, %v3111_v5 }
 0x498   :  { %v286_v56 = vadd.f32 %v3411_v3, %v2716_v1  ;;  %v335_v21 = vadd.f32 %v3412_v13, %v2724_v23 }
 0x499   :  { %v1450_v51 = vadd.f32 %v2300_v15, %v1449_v36  ;;  %2301 = vtanh.f32 %v1505_v31 }
 0x49b   :  { %v1454_v58 = vsel %vm1453_vm13, %v2300_v15, %v1450_v51  ;;  %v333_v15 = vadd.f32 %v3410_v18, %v2724_v23 }
 0x49c   :  { %v1459_v55 = vsel %vm1456_vm14, %v1458_v52, %v1454_v58 }
 0x49d   :  { %v1504_v2 = vmul.f32 %v1502_v46, %v1459_v55 }
 0x49f   :  { %v2302_v35 = vpop.eup %2301  ;;  %v1506_v0 = vadd.f32 %v1504_v2, %v379_v26 }
 0x4a0   :  { %v1511_v50 = vmul.f32 %v2302_v35, %v1509_v43 }
 0x4a1   :  { %2303 = vtanh.f32 %v1506_v0 }
 0x4a2   :  { %v3165_v61 = vadd.f32 %v1513_v34, %v1511_v50 }
 0x4a7   :  { %v2304_v19 = vpop.eup %2303 }
 0x4a8   :  { %v1512_v7 = vmul.f32 %v2304_v19, %v1510_v47 }
 0x4aa   :  { %v3168_v10 = vadd.f32 %v1514_v59, %v1512_v7  ;;  %v3413_v59 = vld [vmem:[#allocation36_spill] sm:$0xff] }
 0x4ac   :  { %v1531_v9 = vpack.c.bf16 %v3168_v10, %v3165_v61 }
 0x4ae   :  { %1540 = vmatmul.bf16.vlgmr.msra.gmra.mxu2 %v1531_v9  ;;  %1554 = vmatmul.bf16.vlgmr.msrb.gmra.mxu3 %v1531_v9 }
 0x4af   :  { %1568 = vmatmul.bf16.vlgmr.msrb.gmra.mxu0 %v1531_v9  ;;  %v382_v9 = vadd.f32 %v3413_v59, %v2754_v25 }
 0x52c   :  { %v1569_v26 = vpop.f32.mrf.mxu0 }
 0x52d   :  { %v1654_v34 = vadd.f32 %v3089_v57, %v1569_v26 }
 0x531   :  { %v1541_v44 = vpop.f32.mrf.mxu2  ;;  %v1555_v27 = vpop.f32.mrf.mxu3 }
 0x532   :  { %v1574_v28 = vadd.f32 %v1541_v44, %v284_v24  ;;  %v1614_v53 = vadd.f32 %v1555_v27, %v333_v15 }
 0x534   :  { %v2124_v49 = vmul.f32 -1.442695, %v1574_v28  ;;  %v2126_v14 = vmul.f32 -1.442695, %v1614_v53 }
 0x536   :  { %2305 = vpow2.f32 %v2124_v49 }
 0x537   :  { %2307 = vpow2.f32 %v2126_v14 }
 0x539   :  { %v1543_v29 = vpop.f32.mrf.mxu2  ;;  %v1557_v32 = vpop.f32.mrf.mxu3 }
 0x53a   :  { %v1575_v4 = vadd.f32 %v1543_v29, %v286_v56  ;;  %v1615_v11 = vadd.f32 %v1557_v32, %v335_v21  ;;  %v1571_v56 = vpop.f32.mrf.mxu0 }
 0x53c   :  { %v2306_v36 = vpop.eup %2305  ;;  %v2125_v22 = vmul.f32 -1.442695, %v1575_v4  ;;  %v2127_v6 = vmul.f32 -1.442695, %v1615_v11 }
 0x53d   :  { %v2308_v31 = vpop.eup %2307  ;;  %v1582_v40 = vadd.f32 1.0, %v2306_v36  ;;  %v1655_v36 = vadd.f32 %v3089_v57, %v1571_v56  ;;  %v1850_v56 = vld [vmem:[%s3355_s7 + $0x50] sm:$0xff] }
 0x53e   :  { %v1622_v42 = vadd.f32 1.0, %v2308_v31  ;;  %2309 = vpow2.f32 %v2125_v22 }
 0x53f   :  { %2311 = vrcp.f32 %v1582_v40  ;;  %v1595_v38 = vand.u32 2147483648, %v1582_v40  ;;  %v1593_v43 = vand.u32 2147483647, %v1582_v40  ;;  %vm1589_vm4 = vweird.f32 %v1582_v40 }
 0x540   :  { %2313 = vrcp.f32 %v1622_v42  ;;  %v1635_v24 = vand.u32 2147483648, %v1622_v42  ;;  %vm1629_vm8 = vweird.f32 %v1622_v42  ;;  %v1633_v15 = vand.u32 2147483647, %v1622_v42 }
 0x541   :  { %2315 = vpow2.f32 %v2127_v6  ;;  %v1596_v50 = vor.u32 1.1754944e-38, %v1595_v38  ;;  %vm1594_vm6 = vcmp.eq.f32.partialorder %v1593_v43, 8.507059e+37  ;;  %v3416_v6 = vld [vmem:[#allocation37_spill] sm:$0xff] }
 0x542   :  { %v1636_v21 = vor.u32 1.1754944e-38, %v1635_v24  ;;  %vm1634_vm12 = vcmp.eq.f32.partialorder %v1633_v15, 8.507059e+37  ;;  %v1852_v15 = vld [vmem:[%s3355_s7 + $0x60] sm:$0xff] }
 0x544   :  { %v2310_v48 = vpop.eup %2309 }
 0x545   :  { %v2312_v51 = vpop.eup %2311  ;;  %v1583_v52 = vadd.f32 1.0, %v2310_v48 }
 0x546   :  { %v2314_v46 = vpop.eup %2313  ;;  %v1585_v58 = vmul.f32 %v2312_v51, %v1582_v40  ;;  %vm1590_vm3 = vweird.f32 %v2312_v51 }
 0x547   :  { %v2316_v60 = vpop.eup %2315  ;;  %v1625_v8 = vmul.f32 %v2314_v46, %v1622_v42  ;;  %2317 = vrcp.f32 %v1583_v52  ;;  %vm1591_vm5 = vmor %vm1589_vm4, %vm1590_vm3  ;;  %vm1630_vm7 = vweird.f32 %v2314_v46  ;;  %v1610_v44 = vand.u32 2147483648, %v1583_v52 }
 0x548   :  { %v1586_v55 = vsub.f32 1.0, %v1585_v58  ;;  %v3180_v16 = vadd.f32 1.0, %v2316_v60  ;;  %vm3187_vm9 = vmor %vm1629_vm8, %vm1630_vm7  ;;  %v1608_v14 = vand.u32 2147483647, %v1583_v52  ;;  %vm1604_vm11 = vweird.f32 %v1583_v52 }
 0x549   :  { %v1626_v2 = vsub.f32 1.0, %v1625_v8  ;;  %v1611_v32 = vor.u32 1.1754944e-38, %v1610_v44  ;;  %v384_v42 = vadd.f32 %v3416_v6, %v2754_v25  ;;  %v3419_v44 = vld [vmem:[#allocation31_spill] sm:$0xff] }
 0x54a   :  { %v1587_v20 = vmul.f32 %v2312_v51, %v1586_v55  ;;  %2319 = vrcp.f32 %v3180_v16  ;;  %vm1609_vm14 = vcmp.eq.f32.partialorder %v1608_v14, 8.507059e+37  ;;  %vm1644_vm0 = vweird.f32 %v3180_v16 }
 0x54b   :  { %v1627_v35 = vmul.f32 %v2314_v46, %v1626_v2 }
 0x54c   :  { %v1588_v0 = vadd.f32 %v2312_v51, %v1587_v20 }
 0x54d   :  { %v2318_v39 = vpop.eup %2317  ;;  %v1628_v19 = vadd.f32 %v2314_v46, %v1627_v35 }
 0x54e   :  { %v1592_v41 = vsel %vm1591_vm5, %v2312_v51, %v1588_v0  ;;  %v1600_v62 = vmul.f32 %v2318_v39, %v1583_v52  ;;  %vm1605_vm10 = vweird.f32 %v2318_v39  ;;  %v1650_v51 = vand.u32 2147483648, %v3180_v16 }
 0x54f   :  { %v1597_v47 = vsel %vm1594_vm6, %v1596_v50, %v1592_v41  ;;  %v1632_v3 = vsel %vm3187_vm9, %v2314_v46, %v1628_v19  ;;  %vm1606_vm13 = vmor %vm1604_vm11, %vm1605_vm10  ;;  %v1648_v52 = vand.u32 2147483647, %v3180_v16 }
 0x550   :  { %v2320_v7 = vpop.eup %2319  ;;  %v1656_v33 = vmul.f32 %v1654_v34, %v1597_v47  ;;  %v1601_v18 = vsub.f32 1.0, %v1600_v62  ;;  %v1637_v11 = vsel %vm1634_vm12, %v1636_v21, %v1632_v3  ;;  %v1651_v38 = vor.u32 1.1754944e-38, %v1650_v51  ;;  %v3417_v34 = vld [vmem:[#allocation29_spill] sm:$0xff] }
 0x551   :  { %v1640_v27 = vmul.f32 %v2320_v7, %v3180_v16  ;;  %vm1645_vm15 = vweird.f32 %v2320_v7  ;;  %v1662_v46 = vsub.f32 1.0, %v1637_v11  ;;  %v1666_v26 = vmul.f32 %v1637_v11, %v3165_v61  ;;  %v1855_v47 = vld [vmem:[%s3355_s7 + $0x78] sm:$0xff] }
 0x552   :  { %v1658_v28 = vadd.f32 %v1656_v33, %v382_v9  ;;  %v1602_v49 = vmul.f32 %v2318_v39, %v1601_v18  ;;  %vm1646_vm1 = vmor %vm1644_vm0, %vm1645_vm15  ;;  %vm1649_vm2 = vcmp.eq.f32.partialorder %v1648_v52, 8.507059e+37  ;;  %v289_v41 = vadd.f32 %v3417_v34, %v2716_v1  ;;  %1856 = vmatpush.msra.mxu0 %v1855_v47  ;;  %v1853_v9 = vld [vmem:[%s3355_s7 + $0x68] sm:$0xff]  ;;  %v3418_v33 = vld [vmem:[#allocation33_spill] sm:$0xff] }
 0x553   :  { %v1641_v13 = vsub.f32 1.0, %v1640_v27  ;;  %v338_v24 = vadd.f32 %v3418_v33, %v2724_v23  ;;  %v291_v27 = vadd.f32 %v3419_v44, %v2716_v1  ;;  %v1849_v1 = vld [vmem:[%s3355_s7 + $0x48] sm:$0xff]  ;;  %v754_v47 = vstv %s3247_s9 }
 0x554   :  { %2321 = vtanh.f32 %v1658_v28  ;;  %v1603_v29 = vadd.f32 %v2318_v39, %v1602_v49  ;;  %v1851_v49 = vld [vmem:[%s3355_s7 + $0x58] sm:$0xff]  ;;  %v1841_v34 = vld [vmem:[%s3355_s7 + $0x8] sm:$0xff] }
 0x555   :  { %v1642_v4 = vmul.f32 %v2320_v7, %v1641_v13 }
 0x556   :  { %v1607_v22 = vsel %vm1606_vm13, %v2318_v39, %v1603_v29 }
 0x557   :  { %v1612_v31 = vsel %vm1609_vm14, %v1611_v32, %v1607_v22  ;;  %v1643_v40 = vadd.f32 %v2320_v7, %v1642_v4  ;;  %v3420_v32 = vld [vmem:[#allocation34_spill] sm:$0xff] }
 0x558   :  { %v1657_v48 = vmul.f32 %v1655_v36, %v1612_v31  ;;  %v340_v4 = vadd.f32 %v3420_v32, %v2724_v23  ;;  %v1848_v36 = vld [vmem:[%s3355_s7 + $0x40] sm:$0xff]  ;;  %v1847_v31 = vld [vmem:[%s3355_s7 + $0x38] sm:$0xff]  ;;  %v1846_v23 = vld [vmem:[%s3355_s7 + $0x30] sm:$0xff] }
 0x559   :  { %v1647_v8 = vsel %vm1646_vm1, %v2320_v7, %v1643_v40  ;;  %v1854_v7 = vld [vmem:[%s3355_s7 + $0x70] sm:$0xff] }
 0x55a   :  { %v2322_v58 = vpop.eup %2321  ;;  %v1659_v60 = vadd.f32 %v1657_v48, %v384_v42  ;;  %v1652_v20 = vsel %vm1649_vm2, %v1651_v38, %v1647_v8  ;;  %1857 = vmatpush.msra.mxu0 %v1854_v7  ;;  %v1843_v8 = vld [vmem:[%s3355_s7 + $0x18] sm:$0xff]  ;;  %v1842_v38 = vld [vmem:[%s3355_s7 + $0x10] sm:$0xff]  ;;  %v1840_v7 = vld [vmem:[%s3355_s7] sm:$0xff] }
 0x55b   :  { %v1664_v55 = vmul.f32 %v2322_v58, %v1662_v46  ;;  %v1663_v43 = vsub.f32 1.0, %v1652_v20  ;;  %v1667_v39 = vmul.f32 %v1652_v20, %v3168_v10  ;;  %v1845_v46 = vld [vmem:[%s3355_s7 + $0x28] sm:$0xff] }
 0x55c   :  { %2323 = vtanh.f32 %v1659_v60  ;;  %1858 = vmatpush.msra.mxu0 %v1853_v9  ;;  %v1844_v60 = vld [vmem:[%s3355_s7 + $0x20] sm:$0xff]  ;;  %s3288_s7 = sld [smem:[#allocation5 + $0x3]] }
 0x55d   :  { %v3200_v2 = vadd.f32 %v1666_v26, %v1664_v55 }
 0x55e   :  { %1859 = vmatpush.msra.mxu0 %v1852_v15  ;;  %v3421_v15 = vld [vmem:[#allocation38_spill] sm:$0xff] }
 0x55f   :  { %v387_v44 = vadd.f32 %v3421_v15, %v2754_v25 }
 0x560   :  { %1860 = vmatpush.msra.mxu0 %v1851_v49 }
 0x562   :  { %v2324_v35 = vpop.eup %2323  ;;  %1861 = vmatpush.msra.mxu0 %v1850_v56 }
 0x563   :  { %v1665_v0 = vmul.f32 %v2324_v35, %v1663_v43 }
 0x564   :  { %1862 = vmatpush.msra.mxu0 %v1849_v1 }
 0x565   :  { %v3203_v50 = vadd.f32 %v1667_v39, %v1665_v0 }
 0x566   :  { %1863 = vmatpush.msra.mxu0 %v1848_v36 }
 0x567   :  { %v1684_v16 = vpack.c.bf16 %v3203_v50, %v3200_v2 }
 0x568   :  { %1864 = vmatpush.msra.mxu0 %v1847_v31 }
 0x569   :  { %1693 = vmatmul.bf16.vlgmr.msrb.gmra.mxu1 %v1684_v16  ;;  %1707 = vmatmul.bf16.vlgmr.msrb.gmra.mxu2 %v1684_v16 }
 0x56a   :  { %1721 = vmatmul.bf16.vlgmr.msra.gmra.mxu3 %v1684_v16  ;;  %1865 = vmatpush.msra.mxu0 %v1846_v23 }
 0x56c   :  { %1866 = vmatpush.msra.mxu0 %v1845_v46 }
 0x56e   :  { %1867 = vmatpush.msra.mxu0 %v1844_v60 }
 0x570   :  { %1868 = vmatpush.msra.mxu0 %v1843_v8 }
 0x572   :  { %1869 = vmatpush.msra.mxu0 %v1842_v38 }
 0x574   :  { %1870 = vmatpush.msra.mxu0 %v1841_v34 }
 0x576   :  { %1871 = vmatpush.msra.mxu0 %v1840_v7 }
 0x5e6   :  { %v1694_v62 = vpop.f32.mrf.mxu1 }
 0x5e7   :  { %v1727_v19 = vadd.f32 %v1694_v62, %v289_v41 }
 0x5e9   :  { %v2129_v59 = vmul.f32 -1.442695, %v1727_v19 }
 0x5eb   :  { %2325 = vpow2.f32 %v2129_v59 }
 0x5ec   :  { %v1708_v18 = vpop.f32.mrf.mxu2 }
 0x5ed   :  { %v1767_v28 = vadd.f32 %v1708_v18, %v338_v24  ;;  %v1722_v43 = vpop.f32.mrf.mxu3  ;;  %v907_v18 = vstv %s3258_s4 }
 0x5ee   :  { %v1696_v53 = vpop.f32.mrf.mxu1  ;;  %v1807_v24 = vadd.f32 %v3089_v57, %v1722_v43 }
 0x5ef   :  { %v2131_v14 = vmul.f32 -1.442695, %v1767_v28  ;;  %v1728_v3 = vadd.f32 %v1696_v53, %v291_v27 }
 0x5f1   :  { %v2326_v13 = vpop.eup %2325  ;;  %2327 = vpow2.f32 %v2131_v14  ;;  %v2130_v21 = vmul.f32 -1.442695, %v1728_v3  ;;  %v3422_v3 = vld [vmem:[#allocation14_spill] sm:$0xff] }
 0x5f2   :  { %v1735_v29 = vadd.f32 1.0, %v2326_v13  ;;  %v755_v56 = vmul.f32 %v754_v47, %v3422_v3  ;;  %v3423_v13 = vld [vmem:[#allocation15_spill] sm:$0xff] }
 0x5f3   :  { %2329 = vpow2.f32 %v2130_v21  ;;  %v756_v21 = vmul.f32 %v754_v47, %v3423_v13  ;;  %v1672_v13 = vstv %s3317_s1 }
 0x5f4   :  { %2331 = vrcp.f32 %v1735_v29  ;;  %v1710_v11 = vpop.f32.mrf.mxu2  ;;  %v1748_v26 = vand.u32 2147483648, %v1735_v29  ;;  %v1746_v0 = vand.u32 2147483647, %v1735_v29  ;;  %vm1742_vm4 = vweird.f32 %v1735_v29 }
 0x5f5   :  { %v1768_v22 = vadd.f32 %v1710_v11, %v340_v4 }
 0x5f6   :  { %v1749_v19 = vor.u32 1.1754944e-38, %v1748_v26  ;;  %vm1747_vm6 = vcmp.eq.f32.partialorder %v1746_v0, 8.507059e+37  ;;  %v3426_v26 = vld [vmem:[#allocation39_spill] sm:$0xff] }
 0x5f7   :  { %v2328_v40 = vpop.eup %2327  ;;  %v2132_v6 = vmul.f32 -1.442695, %v1768_v22  ;;  %v908_v22 = vmul.f32 %v907_v18, %v2909_v30  ;;  %v1060_v30 = vstv %s3274_s18  ;;  %v389_v38 = vadd.f32 %v3426_v26, %v2754_v25 }
 0x5f8   :  { %v3242_v42 = vadd.f32 1.0, %v2328_v40 }
 0x5f9   :  { %v2330_v48 = vpop.eup %2329  ;;  %2333 = vpow2.f32 %v2132_v6 }
 0x5fa   :  { %v2332_v51 = vpop.eup %2331  ;;  %2335 = vrcp.f32 %v3242_v42  ;;  %v3253_v58 = vadd.f32 1.0, %v2330_v48  ;;  %v1788_v49 = vand.u32 2147483648, %v3242_v42  ;;  %vm1782_vm8 = vweird.f32 %v3242_v42 }
 0x5fb   :  { %v1738_v52 = vmul.f32 %v2332_v51, %v1735_v29  ;;  %vm1743_vm3 = vweird.f32 %v2332_v51  ;;  %v1786_v29 = vand.u32 2147483647, %v3242_v42 }
 0x5fc   :  { %2337 = vrcp.f32 %v3253_v58  ;;  %vm1744_vm5 = vmor %vm1742_vm4, %vm1743_vm3  ;;  %v1763_v11 = vand.u32 2147483648, %v3253_v58  ;;  %v1761_v6 = vand.u32 2147483647, %v3253_v58  ;;  %v1789_v23 = vor.u32 1.1754944e-38, %v1788_v49 }
 0x5fd   :  { %v1739_v55 = vsub.f32 1.0, %v1738_v52  ;;  %vm1787_vm11 = vcmp.eq.f32.partialorder %v1786_v29, 8.507059e+37  ;;  %vm1757_vm12 = vweird.f32 %v3253_v58  ;;  %v909_v52 = vmul.f32 %v907_v18, %v2911_v37 }
 0x5fe   :  { %vm1762_vm14 = vcmp.eq.f32.partialorder %v1761_v6, 8.507059e+37  ;;  %v1213_v37 = vstv %s3288_s7 }
 0x5ff   :  { %v2334_v20 = vpop.eup %2333  ;;  %v1740_v35 = vmul.f32 %v2332_v51, %v1739_v55  ;;  %v1764_v55 = vor.u32 1.1754944e-38, %v1763_v11  ;;  %v1215_v18 = vmul.f32 %v1213_v37, %v3047_v12  ;;  %v1825_v11 = vstv %s3328_s5 }
 0x600   :  { %v2336_v39 = vpop.eup %2335  ;;  %v3267_v16 = vadd.f32 1.0, %v2334_v20 }
 0x601   :  { %v1778_v41 = vmul.f32 %v2336_v39, %v3242_v42  ;;  %v1741_v62 = vadd.f32 %v2332_v51, %v1740_v35  ;;  %vm1783_vm7 = vweird.f32 %v2336_v39  ;;  %v1061_v35 = vmul.f32 %v1060_v30, %v2991_v54 }
 0x602   :  { %2339 = vrcp.f32 %v3267_v16  ;;  %v2338_v59 = vpop.eup %2337  ;;  %vm3295_vm9 = vmor %vm1782_vm8, %vm1783_vm7  ;;  %v1803_v34 = vand.u32 2147483648, %v3267_v16  ;;  %vm1797_vm0 = vweird.f32 %v3267_v16  ;;  %v910_v54 = vadd.f32 %v908_v22, %v755_v56 }
 0x603   :  { %v1779_v9 = vsub.f32 1.0, %v1778_v41  ;;  %v1745_v33 = vsel %vm1744_vm5, %v2332_v51, %v1741_v62  ;;  %v1753_v28 = vmul.f32 %v2338_v59, %v3253_v58  ;;  %vm1758_vm10 = vweird.f32 %v2338_v59  ;;  %v1724_v51 = vpop.f32.mrf.mxu3 }
 0x604   :  { %v1750_v27 = vsel %vm1747_vm6, %v1749_v19, %v1745_v33  ;;  %vm1759_vm13 = vmor %vm1757_vm12, %vm1758_vm10  ;;  %v1808_v43 = vadd.f32 %v3089_v57, %v1724_v51  ;;  %v1062_v62 = vmul.f32 %v1060_v30, %v2994_v45  ;;  %v1801_v57 = vand.u32 2147483647, %v3267_v16 }
 0x605   :  { %v1780_v53 = vmul.f32 %v2336_v39, %v1779_v9  ;;  %v1809_v14 = vmul.f32 %v1807_v24, %v1750_v27  ;;  %v1754_v1 = vsub.f32 1.0, %v1753_v28  ;;  %v911_v33 = vadd.f32 %v909_v52, %v756_v21 }
 0x606   :  { %v1214_v45 = vmul.f32 %v1213_v37, %v3044_v17  ;;  %v1366_v24 = vstv %s3300_s20  ;;  %v1063_v27 = vadd.f32 %v1061_v35, %v910_v54  ;;  %vm1802_vm2 = vcmp.eq.f32.partialorder %v1801_v57, 8.507059e+37 }
 0x607   :  { %v1781_v32 = vadd.f32 %v2336_v39, %v1780_v53  ;;  %v1811_v4 = vadd.f32 %v1809_v14, %v387_v44  ;;  %v1755_v40 = vmul.f32 %v2338_v59, %v1754_v1  ;;  %v1804_v44 = vor.u32 1.1754944e-38, %v1803_v34 }
 0x608   :  { %v2340_v36 = vpop.eup %2339  ;;  %v1064_v28 = vadd.f32 %v1062_v62, %v911_v33  ;;  %v1367_v53 = vmul.f32 %v1366_v24, %v3108_v63  ;;  %v1368_v49 = vmul.f32 %v1366_v24, %v3111_v5  ;;  %v1519_v14 = vstv %s3311_s21 }
 0x609   :  { %v1785_v42 = vsel %vm3295_vm9, %v2336_v39, %v1781_v32  ;;  %2341 = vtanh.f32 %v1811_v4  ;;  %v1793_v48 = vmul.f32 %v2340_v36, %v3267_v16  ;;  %v1756_v46 = vadd.f32 %v2338_v59, %v1755_v40 }
 0x60a   :  { %v1790_v60 = vsel %vm1787_vm11, %v1789_v23, %v1785_v42  ;;  %vm1798_vm15 = vweird.f32 %v2340_v36  ;;  %v1216_v3 = vadd.f32 %v1214_v45, %v1063_v27  ;;  %v1217_v56 = vadd.f32 %v1215_v18, %v1064_v28 }
 0x60b   :  { %v1794_v8 = vsub.f32 1.0, %v1793_v48  ;;  %v1760_v20 = vsel %vm1759_vm13, %v2338_v59, %v1756_v46  ;;  %v1815_v39 = vsub.f32 1.0, %v1790_v60  ;;  %v1819_v7 = vmul.f32 %v1790_v60, %v3200_v2  ;;  %vm3324_vm1 = vmor %vm1797_vm0, %vm1798_vm15 }
 0x60c   :  { %v1765_v58 = vsel %vm1762_vm14, %v1764_v55, %v1760_v20  ;;  %v1520_v21 = vmul.f32 %v1519_v14, %v3165_v61  ;;  %v1521_v12 = vmul.f32 %v1519_v14, %v3168_v10  ;;  %v1369_v32 = vadd.f32 %v1367_v53, %v1216_v3 }
 0x60d   :  { %v1795_v0 = vmul.f32 %v2340_v36, %v1794_v8  ;;  %v1810_v41 = vmul.f32 %v1808_v43, %v1765_v58  ;;  %v1370_v4 = vadd.f32 %v1368_v49, %v1217_v56  ;;  %v1673_v63 = vmul.f32 %v1672_v13, %v3200_v2 }
 0x60e   :  { %v1674_v5 = vmul.f32 %v1672_v13, %v3203_v50  ;;  %v1522_v40 = vadd.f32 %v1520_v21, %v1369_v32  ;;  %vm1898_vm7 = vcmask 7168  }
 0x60f   :  { %v2342_v25 = vpop.eup %2341  ;;  %v1796_v47 = vadd.f32 %v2340_v36, %v1795_v0  ;;  %v1812_v9 = vadd.f32 %v1810_v41, %v389_v38  ;;  %v1523_v6 = vadd.f32 %v1521_v12, %v1370_v4 }
 0x610   :  { %v1817_v19 = vmul.f32 %v2342_v25, %v1815_v39  ;;  %v1675_v42 = vadd.f32 %v1673_v63, %v1522_v40 }
 0x611   :  { %v1800_v16 = vsel %vm3324_vm1, %v2340_v36, %v1796_v47  ;;  %2343 = vtanh.f32 %v1812_v9  ;;  %v1676_v61 = vadd.f32 %v1674_v5, %v1523_v6 }
 0x612   :  { %v1821_v15 = vadd.f32 %v1819_v7, %v1817_v19  ;;  %v1805_v17 = vsel %vm1802_vm2, %v1804_v44, %v1800_v16 }
 0x613   :  { %v1816_v29 = vsub.f32 1.0, %v1805_v17  ;;  %v1820_v22 = vmul.f32 %v1805_v17, %v3203_v50 }
 0x614   :  { %v1826_v23 = vmul.f32 %v1825_v11, %v1821_v15 }
 0x616   :  { %v1828_v10 = vadd.f32 %v1826_v23, %v1675_v42 }
 0x617   :  { %v2344_v1 = vpop.eup %2343 }
 0x618   :  { %v1818_v36 = vmul.f32 %v2344_v1, %v1816_v29 }
 0x61a   :  { %v1822_v31 = vadd.f32 %v1820_v22, %v1818_v36 }
 0x61c   :  { %v1827_v48 = vmul.f32 %v1825_v11, %v1822_v31 }
 0x61e   :  { %v1829_v51 = vadd.f32 %v1827_v48, %v1676_v61 }
 0x620   :  { %v1839_v30 = vsub.f32 %v1829_v51, %v1828_v10 }
 0x622   :  { %1872 = vmatmul.f32.vlgmr.msra.gmra.mxu0 %v1839_v30 }
 0x69f   :  { %v1873_v46 = vpop.f32.mrf.mxu0 }
 0x6a0   :  { %v2134_v52 = vclamps-f32 %v1873_v46, 50.0 }
 0x6a2   :  { %v1878_v60 = vmul.f32 1.442695, %v2134_v52 }
 0x6a4   :  { %2345 = vpow2.f32 %v1878_v60 }
 0x6aa   :  { %v2346_v8 = vpop.eup %2345 }
 0x6ab   :  { %v1880_v55 = vadd.f32 1.0, %v2346_v8 }
 0x6ad   :  { %2347 = vrcp.f32 %v1880_v55  ;;  %v1892_v38 = vand.u32 2147483648, %v1880_v55  ;;  %v1890_v43 = vand.u32 2147483647, %v1880_v55  ;;  %vm1886_vm4 = vweird.f32 %v1880_v55 }
 0x6af   :  { %v1893_v0 = vor.u32 1.1754944e-38, %v1892_v38  ;;  %vm1891_vm6 = vcmp.eq.f32.partialorder %v1890_v43, 8.507059e+37 }
 0x6b3   :  { %v2348_v2 = vpop.eup %2347 }
 0x6b4   :  { %v1882_v50 = vmul.f32 %v2348_v2, %v1880_v55  ;;  %vm1887_vm3 = vweird.f32 %v2348_v2 }
 0x6b5   :  { %vm1888_vm5 = vmor %vm1886_vm4, %vm1887_vm3 }
 0x6b6   :  { %v1883_v26 = vsub.f32 1.0, %v1882_v50 }
 0x6b8   :  { %v1884_v20 = vmul.f32 %v2348_v2, %v1883_v26 }
 0x6ba   :  { %v1885_v35 = vadd.f32 %v2348_v2, %v1884_v20 }
 0x6bc   :  { %v1889_v58 = vsel %vm1888_vm5, %v2348_v2, %v1885_v35 }
 0x6bd   :  { %v1894_v37 = vsel %vm1891_vm6, %v1893_v0, %v1889_v58 }
 0x6be   :  { %v1896_v39 = vmul.f32 0.9, %v1894_v37 }
 0x6c0   :  { %v1897_v34 = vadd.f32 0.05, %v1896_v39 }
 0x6c2   :  { %1899 = vst.msk [vmem:[%s3356_s8] sm:$0xff] %vm1898_vm7, %v1897_v34 }
 0x6c3   :  { %1904 = vsyncpa [#allocation6], 1 }
 0x6c4   :  { %1905 = vsyncpa [#allocation10], 1 }
 0x6c5   :  { %1906 = vsyncpa [#allocation7], 1 }

</bundles_post_ra>
